<compile_context>
chip_gen: v7x
topology: tpu7x:2x2x1
jax: 0.10.0
libtpu: 0.0.40
codegen_flags: <defaults>
</compile_context>

<pallas_src>
import functools
import math

import jax
import jax.numpy as jnp
from jax.experimental import pallas as pl
from jax.experimental.pallas import tpu as pltpu

LANE = 128          # TPU lane width: all matmul N dims / stored channels padded to this
OC_PAD = 128        # conv output channels padded to 128 (zero weights/bias for pad)


def conv_size(W, k, p, s):
    return int((W + 2 * p - (k - 1) - 1) / s + 1)


# ----------------------------------------------------------------------------
# Pallas kernels
# ----------------------------------------------------------------------------
def _conv_mm_kernel(a_ref, w_ref, b_ref, o_ref):
    """Fused (patches @ W) + bias, ReLU.  bf16 in, f32 acc, bf16 out."""
    acc = jnp.dot(a_ref[...], w_ref[...], preferred_element_type=jnp.float32)
    o_ref[...] = jnp.maximum(acc + b_ref[...], 0.0).astype(o_ref.dtype)


def _conv_mm_scaled_kernel(a_ref, w_ref, b_ref, scale_ref, o_ref):
    """Same as above, plus the fused x / x.max() scale on the f32 accumulator
    (conv is linear, so scaling the accumulator == normalizing the input)."""
    acc = jnp.dot(a_ref[...], w_ref[...], preferred_element_type=jnp.float32)
    acc = acc * scale_ref[0, 0]
    o_ref[...] = jnp.maximum(acc + b_ref[...], 0.0).astype(o_ref.dtype)


def _head_kernel(feat_ref, w1_ref, b1_ref, w2_ref, b2_ref, o_ref, *, n_actions):
    """Whole dueling head: value1/advantage1 (+ReLU), value2/advantage2,
    and the dueling combine, in one kernel.  Column layout of the second
    matmul result y: col 0 = value, cols 1..n_actions = advantage, rest 0."""
    h = jnp.dot(feat_ref[...], w1_ref[...], preferred_element_type=jnp.float32)
    h = jnp.maximum(h + b1_ref[...], 0.0)                      # (B, 2*Hp) f32
    y = jnp.dot(h.astype(w2_ref.dtype), w2_ref[...],
                preferred_element_type=jnp.float32)
    y = y + b2_ref[...]                                        # (B, 128) f32

    B, Np = y.shape
    lane = jax.lax.broadcasted_iota(jnp.int32, (B, Np), 1)
    adv_mask = (lane >= 1) & (lane <= n_actions)
    # torch .mean() with no dim: mean over ALL advantage elements (incl. batch).
    # TODO(synk): if the head is ever grid-tiled over batch, this global mean
    # needs a two-pass / accumulator scheme.
    adv_mean = jnp.sum(jnp.where(adv_mask, y, 0.0)) * (1.0 / (B * n_actions))
    value = jnp.sum(jnp.where(lane == 0, y, 0.0), axis=1, keepdims=True)  # (B,1)
    # Lane-dense store; wrapper slices cols [1, 1+n_actions) = value + adv - mean.
    o_ref[...] = value + y - adv_mean


# ----------------------------------------------------------------------------
# Pallas wrappers
# ----------------------------------------------------------------------------
def _choose_tile_m(M, cap=512):
    for tm in (cap, 256, 128, 64, 32, 16):
        if tm <= M and M % tm == 0:
            return tm
    return M  # full-extent fallback (small / ragged M)


def conv_matmul(a, w, b, scale=None):
    """a:(M,K) bf16 patches, w:(K,128) bf16, b:(1,128) f32, scale:(1,1) f32 or None."""
    M, K = a.shape
    _, N = w.shape
    tm = _choose_tile_m(M)
    Mp = M
    if tm == M and M > 1024:
        # Safety valve for very large ragged M: pad rows so the grid can tile
        # (keeps per-step VMEM bounded on v7x's 64 MiB).
        Mp = ((M + 255) // 256) * 256
        a = jnp.pad(a, ((0, Mp - M), (0, 0)))
        tm = 256

    in_specs = [
        pl.BlockSpec((tm, K), lambda i: (i, 0)),
        pl.BlockSpec((K, N), lambda i: (0, 0)),   # weights resident across grid
        pl.BlockSpec((1, N), lambda i: (0, 0)),   # bias resident across grid
    ]
    args = [a, w, b]
    if scale is not None:
        in_specs.append(pl.BlockSpec(memory_space=pltpu.MemorySpace.SMEM))
        args.append(scale)
        kernel = _conv_mm_scaled_kernel
    else:
        kernel = _conv_mm_kernel

    out = pl.pallas_call(
        kernel,
        out_shape=jax.ShapeDtypeStruct((Mp, N), jnp.bfloat16),
        grid=(Mp // tm,),
        in_specs=in_specs,
        out_specs=pl.BlockSpec((tm, N), lambda i: (i, 0)),
        compiler_params=pltpu.CompilerParams(
            dimension_semantics=("parallel",)),
    )(*args)
    return out[:M] if Mp != M else out


def dueling_head(feat, w1, b1, w2, b2, *, n_actions):
    B, F = feat.shape
    _, H2 = w1.shape
    _, Np = w2.shape
    kernel = functools.partial(_head_kernel, n_actions=n_actions)
    return pl.pallas_call(
        kernel,
        out_shape=jax.ShapeDtypeStruct((B, Np), jnp.float32),
        in_specs=[
            pl.BlockSpec((B, F), lambda: (0, 0)),
            pl.BlockSpec((F, H2), lambda: (0, 0)),
            pl.BlockSpec((1, H2), lambda: (0, 0)),
            pl.BlockSpec((H2, Np), lambda: (0, 0)),
            pl.BlockSpec((1, Np), lambda: (0, 0)),
        ],
        out_specs=pl.BlockSpec((B, Np), lambda: (0, 0)),
    )(feat, w1, b1, w2, b2)


# ----------------------------------------------------------------------------
# XLA glue: im2col patch extraction (strided slices, fuses under jit)
# ----------------------------------------------------------------------------
def im2col_nhwc(x, k, s):
    """x:(B,H,W,C) -> (B*OH*OW, k*k*C); K ordering = (di, dj, c)."""
    B, H, W, C = x.shape
    OH = (H - k) // s + 1
    OW = (W - k) // s + 1
    cols = []
    for di in range(k):
        for dj in range(k):
            cols.append(x[:, di:di + s * OH:s, dj:dj + s * OW:s, :])  # (B,OH,OW,C)
    patches = jnp.concatenate(cols, axis=-1)                          # (B,OH,OW,k*k*C)
    return patches.reshape(B * OH * OW, k * k * C), (B, OH, OW)


# ----------------------------------------------------------------------------
# Parameter construction (PyTorch-like shapes) + one-time kernel packing
# ----------------------------------------------------------------------------
def _uniform(key, shape, fan_in):
    bound = 1.0 / math.sqrt(fan_in)
    return jax.random.uniform(key, shape, jnp.float32, -bound, bound)


def init_params(key, img_shape, n_channels, hidden_layer, numb_outputs):
    c1 = conv_size(img_shape, 8, 0, 4)
    c2 = conv_size(c1, 4, 0, 2)
    c3 = conv_size(c2, 3, 0, 1)
    assert c3 >= 1, "0-shaped convolution output"
    flat = c3 * c3 * 64

    keys = jax.random.split(key, 14)
    p = {}
    p["conv1_w"] = _uniform(keys[0], (32, n_channels, 8, 8), n_channels * 8 * 8)
    p["conv1_b"] = _uniform(keys[1], (32,), n_channels * 8 * 8)
    p["conv2_w"] = _uniform(keys[2], (64, 32, 4, 4), 32 * 4 * 4)
    p["conv2_b"] = _uniform(keys[3], (64,), 32 * 4 * 4)
    p["conv3_w"] = _uniform(keys[4], (64, 64, 3, 3), 64 * 3 * 3)
    p["conv3_b"] = _uniform(keys[5], (64,), 64 * 3 * 3)
    p["value1_w"] = _uniform(keys[6], (hidden_layer, flat), flat)
    p["value1_b"] = _uniform(keys[7], (hidden_layer,), flat)
    p["value2_w"] = _uniform(keys[8], (1, hidden_layer), hidden_layer)
    p["value2_b"] = _uniform(keys[9], (1,), hidden_layer)
    p["advantage1_w"] = _uniform(keys[10], (hidden_layer, flat), flat)
    p["advantage1_b"] = _uniform(keys[11], (hidden_layer,), flat)
    p["advantage2_w"] = _uniform(keys[12], (numb_outputs, hidden_layer), hidden_layer)
    p["advantage2_b"] = _uniform(keys[13], (numb_outputs,), hidden_layer)
    return p


def prepare_params(params, img_shape, n_channels, hidden_layer, numb_outputs):
    """One-time pre-transpose / pad / pack / bf16-cast of all weights."""
    c1 = conv_size(img_shape, 8, 0, 4)
    c2 = conv_size(c1, 4, 0, 2)
    c3 = conv_size(c2, 3, 0, 1)
    hp = max(LANE, ((hidden_layer + LANE - 1) // LANE) * LANE)  # padded hidden
    n_out_pad = LANE
    assert 1 + numb_outputs <= n_out_pad

    def prep_conv(w, b, cin_pad):
        oc, cin, k, _ = w.shape
        w = jnp.transpose(w, (2, 3, 1, 0))                                 # (k,k,cin,oc)
        w = jnp.pad(w, ((0, 0), (0, 0), (0, cin_pad - cin), (0, OC_PAD - oc)))
        w = w.reshape(k * k * cin_pad, OC_PAD).astype(jnp.bfloat16)        # (K, 128)
        b = jnp.pad(b, (0, OC_PAD - b.shape[0])).reshape(1, OC_PAD).astype(jnp.float32)
        return w, b

    p = {}
    p["conv1_w"], p["conv1_b"] = prep_conv(params["conv1_w"], params["conv1_b"], n_channels)
    p["conv2_w"], p["conv2_b"] = prep_conv(params["conv2_w"], params["conv2_b"], OC_PAD)
    p["conv3_w"], p["conv3_b"] = prep_conv(params["conv3_w"], params["conv3_b"], OC_PAD)

    def prep_fc1(w, b):
        # torch weight (hidden, 64*c3*c3) in (C,H,W) flat order
        #   -> (c3*c3*OC_PAD, hp) in the kernel's (H,W,Cpad) feature order.
        w = w.reshape(hidden_layer, 64, c3, c3)
        w = jnp.transpose(w, (2, 3, 1, 0))                                 # (H,W,C,hidden)
        w = jnp.pad(w, ((0, 0), (0, 0), (0, OC_PAD - 64), (0, hp - hidden_layer)))
        w = w.reshape(c3 * c3 * OC_PAD, hp)
        b = jnp.pad(b, (0, hp - hidden_layer))
        return w, b

    wv1, bv1 = prep_fc1(params["value1_w"], params["value1_b"])
    wa1, ba1 = prep_fc1(params["advantage1_w"], params["advantage1_b"])
    p["head_w1"] = jnp.concatenate([wv1, wa1], axis=1).astype(jnp.bfloat16)        # (F, 2hp)
    p["head_b1"] = jnp.concatenate([bv1, ba1]).reshape(1, 2 * hp).astype(jnp.float32)

    # Block-diagonal second layer: col 0 = value2, cols 1..A = advantage2.
    w2 = jnp.zeros((2 * hp, n_out_pad), jnp.float32)
    w2 = w2.at[:hidden_layer, 0].set(params["value2_w"][0])
    w2 = w2.at[hp:hp + hidden_layer, 1:1 + numb_outputs].set(params["advantage2_w"].T)
    p["head_w2"] = w2.astype(jnp.bfloat16)
    b2 = jnp.zeros((1, n_out_pad), jnp.float32)
    b2 = b2.at[0, 0].set(params["value2_b"][0])
    b2 = b2.at[0, 1:1 + numb_outputs].set(params["advantage2_b"])
    p["head_b2"] = b2
    return p


# ----------------------------------------------------------------------------
# Forward pass (mirrors NeuralNetwork.forward)
# ----------------------------------------------------------------------------
def forward(prepped, x, *, normalize_image, numb_outputs):
    if normalize_image:
        inv = (1.0 / jnp.max(x)).reshape(1, 1).astype(jnp.float32)   # global max (torch x/x.max())
    else:
        inv = None

    x = jnp.transpose(x, (0, 2, 3, 1)).astype(jnp.bfloat16)          # NHWC, bf16 activations

    # conv1 (k8, s4) — normalization scale fused into the accumulator
    patches, (B, OH, OW) = im2col_nhwc(x, 8, 4)
    out = conv_matmul(patches, prepped["conv1_w"], prepped["conv1_b"], inv)
    x = out.reshape(B, OH, OW, OC_PAD)

    # conv2 (k4, s2)
    patches, (B, OH, OW) = im2col_nhwc(x, 4, 2)
    out = conv_matmul(patches, prepped["conv2_w"], prepped["conv2_b"])
    x = out.reshape(B, OH, OW, OC_PAD)

    # conv3 (k3, s1)
    patches, (B, OH, OW) = im2col_nhwc(x, 3, 1)
    out = conv_matmul(patches, prepped["conv3_w"], prepped["conv3_b"])
    feat = out.reshape(B, OH * OW * OC_PAD)                           # (B, F) bf16

    # fused dueling head (value1/value2/advantage1/advantage2 + combine)
    head_out = dueling_head(feat, prepped["head_w1"], prepped["head_b1"],
                            prepped["head_w2"], prepped["head_b2"],
                            n_actions=numb_outputs)                   # (B, 128) f32
    return head_out[:, 1:1 + numb_outputs]                            # (B, A)


# ----------------------------------------------------------------------------
if __name__ == "__main__":
    # Smallest shapes consistent with the conv stack:
    # img 36 -> conv1(k8,s4) -> 8 -> conv2(k4,s2) -> 3 -> conv3(k3,s1) -> 1
    batch, n_channels, img_shape = 2, 4, 36
    hidden_layer, numb_outputs = 32, 4

    key = jax.random.PRNGKey(0)
    pkey, xkey = jax.random.split(key)
    params = init_params(pkey, img_shape, n_channels, hidden_layer, numb_outputs)
    prepped = prepare_params(params, img_shape, n_channels, hidden_layer, numb_outputs)
    x = jax.random.uniform(xkey, (batch, n_channels, img_shape, img_shape), jnp.float32)

    fwd = jax.jit(functools.partial(forward, normalize_image=True,
                                    numb_outputs=numb_outputs))
    out = fwd(prepped, x)
    jax.block_until_ready(out)
    assert out.shape == (batch, numb_outputs)
    print("KERNEL_OK")
</pallas_src>

<mosaic_0001>
module attributes {stable_mosaic.version = 11 : i64} {
  func.func @_conv_mm_scaled_kernel(%arg0: i32, %arg1: memref<128x256xbf16, #tpu.memory_space<vmem>>, %arg2: memref<256x128xbf16, #tpu.memory_space<vmem>>, %arg3: memref<1x128xf32, #tpu.memory_space<vmem>>, %arg4: memref<1x1xf32, #tpu.memory_space<smem>>, %arg5: memref<128x128xbf16, #tpu.memory_space<vmem>>) attributes {dimension_semantics = [#tpu.dimension_semantics<parallel>], iteration_bounds = array<i64: 1>, scalar_prefetch = 0 : i64, scratch_operands = 0 : i64, tpu.core_type = #tpu.core_type<tc>, window_params = [{transform_indices = @transform_0, window_bounds = array<i64: 128, 256>}, {pipeline_mode = #tpu.pipeline_mode<synchronous>, transform_indices = @transform_1, window_bounds = array<i64: 256, 128>}, {pipeline_mode = #tpu.pipeline_mode<synchronous>, transform_indices = @transform_2, window_bounds = array<i64: 1, 128>}, {transform_indices = @transform_3, window_bounds = array<i64: 1, 1>}, {transform_indices = @transform_4, window_bounds = array<i64: 128, 128>}]} {
    %c0 = arith.constant 0 : index
    %c0_0 = arith.constant 0 : index
    %0 = vector.load %arg1[%c0, %c0_0] : memref<128x256xbf16, #tpu.memory_space<vmem>>, vector<128x256xbf16>
    %c0_1 = arith.constant 0 : index
    %c0_2 = arith.constant 0 : index
    %1 = vector.load %arg2[%c0_1, %c0_2] : memref<256x128xbf16, #tpu.memory_space<vmem>>, vector<256x128xbf16>
    %cst = arith.constant dense<0.000000e+00> : vector<128x128xf32>
    %2 = tpu.matmul %0, %1, %cst {dimension_numbers = #tpu.dot_dimension_numbers<[1], [0], [0], [1], [0, 0, 1, 1], [], []>} : vector<128x256xbf16>, vector<256x128xbf16>, vector<128x128xf32> -> vector<128x128xf32>
    %c0_3 = arith.constant 0 : index
    %c0_4 = arith.constant 0 : index
    %3 = memref.load %arg4[%c0_3, %c0_4] : memref<1x1xf32, #tpu.memory_space<smem>>
    %4 = vector.broadcast %3 : f32 to vector<128x128xf32>
    %5 = arith.mulf %2, %4 : vector<128x128xf32>
    %c0_5 = arith.constant 0 : index
    %c0_6 = arith.constant 0 : index
    %6 = vector.load %arg3[%c0_5, %c0_6] : memref<1x128xf32, #tpu.memory_space<vmem>>, vector<1x128xf32>
    %7 = vector.broadcast %6 : vector<1x128xf32> to vector<128x128xf32>
    %8 = arith.addf %5, %7 : vector<128x128xf32>
    %cst_7 = arith.constant 0.000000e+00 : f32
    %9 = vector.broadcast %cst_7 : f32 to vector<128x128xf32>
    %10 = arith.maximumf %8, %9 : vector<128x128xf32>
    %11 = arith.truncf %10 : vector<128x128xf32> to vector<128x128xbf16>
    %c0_8 = arith.constant 0 : index
    %c0_9 = arith.constant 0 : index
    %12 = vector.load %arg5[%c0_8, %c0_9] : memref<128x128xbf16, #tpu.memory_space<vmem>>, vector<128x128xbf16>
    tpu.vector_store %arg5[%c0_8, %c0_9], %11 {strides = array<i32>} : memref<128x128xbf16, #tpu.memory_space<vmem>>, vector<128x128xbf16>,
    return
  }
  func.func @transform_0(%arg0: i32) -> (i32, i32) {
    %c0_i32 = arith.constant 0 : i32
    %c0_i32_0 = arith.constant 0 : i32
    return %arg0, %c0_i32 : i32, i32
  }
  func.func @transform_1(%arg0: i32) -> (i32, i32) {
    %c0_i32 = arith.constant 0 : i32
    %c0_i32_0 = arith.constant 0 : i32
    %c0_i32_1 = arith.constant 0 : i32
    return %c0_i32, %c0_i32_0 : i32, i32
  }
  func.func @transform_2(%arg0: i32) -> (i32, i32) {
    %c0_i32 = arith.constant 0 : i32
    %c0_i32_0 = arith.constant 0 : i32
    %c0_i32_1 = arith.constant 0 : i32
    return %c0_i32, %c0_i32_0 : i32, i32
  }
  func.func @transform_3(%arg0: i32) -> (i32, i32) {
    %c0_i32 = arith.constant 0 : i32
    %c0_i32_0 = arith.constant 0 : i32
    %c0_i32_1 = arith.constant 0 : i32
    return %c0_i32, %c0_i32_0 : i32, i32
  }
  func.func @transform_4(%arg0: i32) -> (i32, i32) {
    %c0_i32 = arith.constant 0 : i32
    %c0_i32_0 = arith.constant 0 : i32
    return %arg0, %c0_i32 : i32, i32
  }
}

module attributes {stable_mosaic.version = 11 : i64} {
  func.func @_conv_mm_kernel(%arg0: i32, %arg1: memref<18x2048xbf16, #tpu.memory_space<vmem>>, %arg2: memref<2048x128xbf16, #tpu.memory_space<vmem>>, %arg3: memref<1x128xf32, #tpu.memory_space<vmem>>, %arg4: memref<18x128xbf16, #tpu.memory_space<vmem>>) attributes {dimension_semantics = [#tpu.dimension_semantics<parallel>], iteration_bounds = array<i64: 1>, scalar_prefetch = 0 : i64, scratch_operands = 0 : i64, tpu.core_type = #tpu.core_type<tc>, window_params = [{transform_indices = @transform_0, window_bounds = array<i64: 18, 2048>}, {pipeline_mode = #tpu.pipeline_mode<synchronous>, transform_indices = @transform_1, window_bounds = array<i64: 2048, 128>}, {pipeline_mode = #tpu.pipeline_mode<synchronous>, transform_indices = @transform_2, window_bounds = array<i64: 1, 128>}, {transform_indices = @transform_3, window_bounds = array<i64: 18, 128>}]} {
    %c0 = arith.constant 0 : index
    %c0_0 = arith.constant 0 : index
    %0 = vector.load %arg1[%c0, %c0_0] : memref<18x2048xbf16, #tpu.memory_space<vmem>>, vector<18x2048xbf16>
    %c0_1 = arith.constant 0 : index
    %c0_2 = arith.constant 0 : index
    %1 = vector.load %arg2[%c0_1, %c0_2] : memref<2048x128xbf16, #tpu.memory_space<vmem>>, vector<2048x128xbf16>
    %cst = arith.constant dense<0.000000e+00> : vector<18x128xf32>
    %2 = tpu.matmul %0, %1, %cst {dimension_numbers = #tpu.dot_dimension_numbers<[1], [0], [0], [1], [0, 0, 1, 1], [], []>} : vector<18x2048xbf16>, vector<2048x128xbf16>, vector<18x128xf32> -> vector<18x128xf32>
    %c0_3 = arith.constant 0 : index
    %c0_4 = arith.constant 0 : index
    %3 = vector.load %arg3[%c0_3, %c0_4] : memref<1x128xf32, #tpu.memory_space<vmem>>, vector<1x128xf32>
    %4 = vector.broadcast %3 : vector<1x128xf32> to vector<18x128xf32>
    %5 = arith.addf %2, %4 : vector<18x128xf32>
    %cst_5 = arith.constant 0.000000e+00 : f32
    %6 = vector.broadcast %cst_5 : f32 to vector<18x128xf32>
    %7 = arith.maximumf %5, %6 : vector<18x128xf32>
    %8 = arith.truncf %7 : vector<18x128xf32> to vector<18x128xbf16>
    %c0_6 = arith.constant 0 : index
    %c0_7 = arith.constant 0 : index
    %9 = vector.load %arg4[%c0_6, %c0_7] : memref<18x128xbf16, #tpu.memory_space<vmem>>, vector<18x128xbf16>
    tpu.vector_store %arg4[%c0_6, %c0_7], %8 {strides = array<i32>} : memref<18x128xbf16, #tpu.memory_space<vmem>>, vector<18x128xbf16>,
    return
  }
  func.func @transform_0(%arg0: i32) -> (i32, i32) {
    %c0_i32 = arith.constant 0 : i32
    %c0_i32_0 = arith.constant 0 : i32
    return %arg0, %c0_i32 : i32, i32
  }
  func.func @transform_1(%arg0: i32) -> (i32, i32) {
    %c0_i32 = arith.constant 0 : i32
    %c0_i32_0 = arith.constant 0 : i32
    %c0_i32_1 = arith.constant 0 : i32
    return %c0_i32, %c0_i32_0 : i32, i32
  }
  func.func @transform_2(%arg0: i32) -> (i32, i32) {
    %c0_i32 = arith.constant 0 : i32
    %c0_i32_0 = arith.constant 0 : i32
    %c0_i32_1 = arith.constant 0 : i32
    return %c0_i32, %c0_i32_0 : i32, i32
  }
  func.func @transform_3(%arg0: i32) -> (i32, i32) {
    %c0_i32 = arith.constant 0 : i32
    %c0_i32_0 = arith.constant 0 : i32
    return %arg0, %c0_i32 : i32, i32
  }
}

module attributes {stable_mosaic.version = 11 : i64} {
  func.func @_conv_mm_kernel(%arg0: i32, %arg1: memref<2x1152xbf16, #tpu.memory_space<vmem>>, %arg2: memref<1152x128xbf16, #tpu.memory_space<vmem>>, %arg3: memref<1x128xf32, #tpu.memory_space<vmem>>, %arg4: memref<2x128xbf16, #tpu.memory_space<vmem>>) attributes {dimension_semantics = [#tpu.dimension_semantics<parallel>], iteration_bounds = array<i64: 1>, scalar_prefetch = 0 : i64, scratch_operands = 0 : i64, tpu.core_type = #tpu.core_type<tc>, window_params = [{transform_indices = @transform_0, window_bounds = array<i64: 2, 1152>}, {pipeline_mode = #tpu.pipeline_mode<synchronous>, transform_indices = @transform_1, window_bounds = array<i64: 1152, 128>}, {pipeline_mode = #tpu.pipeline_mode<synchronous>, transform_indices = @transform_2, window_bounds = array<i64: 1, 128>}, {transform_indices = @transform_3, window_bounds = array<i64: 2, 128>}]} {
    %c0 = arith.constant 0 : index
    %c0_0 = arith.constant 0 : index
    %0 = vector.load %arg1[%c0, %c0_0] : memref<2x1152xbf16, #tpu.memory_space<vmem>>, vector<2x1152xbf16>
    %c0_1 = arith.constant 0 : index
    %c0_2 = arith.constant 0 : index
    %1 = vector.load %arg2[%c0_1, %c0_2] : memref<1152x128xbf16, #tpu.memory_space<vmem>>, vector<1152x128xbf16>
    %cst = arith.constant dense<0.000000e+00> : vector<2x128xf32>
    %2 = tpu.matmul %0, %1, %cst {dimension_numbers = #tpu.dot_dimension_numbers<[1], [0], [0], [1], [0, 0, 1, 1], [], []>} : vector<2x1152xbf16>, vector<1152x128xbf16>, vector<2x128xf32> -> vector<2x128xf32>
    %c0_3 = arith.constant 0 : index
    %c0_4 = arith.constant 0 : index
    %3 = vector.load %arg3[%c0_3, %c0_4] : memref<1x128xf32, #tpu.memory_space<vmem>>, vector<1x128xf32>
    %4 = vector.broadcast %3 : vector<1x128xf32> to vector<2x128xf32>
    %5 = arith.addf %2, %4 : vector<2x128xf32>
    %cst_5 = arith.constant 0.000000e+00 : f32
    %6 = vector.broadcast %cst_5 : f32 to vector<2x128xf32>
    %7 = arith.maximumf %5, %6 : vector<2x128xf32>
    %8 = arith.truncf %7 : vector<2x128xf32> to vector<2x128xbf16>
    %c0_6 = arith.constant 0 : index
    %c0_7 = arith.constant 0 : index
    %9 = vector.load %arg4[%c0_6, %c0_7] : memref<2x128xbf16, #tpu.memory_space<vmem>>, vector<2x128xbf16>
    tpu.vector_store %arg4[%c0_6, %c0_7], %8 {strides = array<i32>} : memref<2x128xbf16, #tpu.memory_space<vmem>>, vector<2x128xbf16>,
    return
  }
  func.func @transform_0(%arg0: i32) -> (i32, i32) {
    %c0_i32 = arith.constant 0 : i32
    %c0_i32_0 = arith.constant 0 : i32
    return %arg0, %c0_i32 : i32, i32
  }
  func.func @transform_1(%arg0: i32) -> (i32, i32) {
    %c0_i32 = arith.constant 0 : i32
    %c0_i32_0 = arith.constant 0 : i32
    %c0_i32_1 = arith.constant 0 : i32
    return %c0_i32, %c0_i32_0 : i32, i32
  }
  func.func @transform_2(%arg0: i32) -> (i32, i32) {
    %c0_i32 = arith.constant 0 : i32
    %c0_i32_0 = arith.constant 0 : i32
    %c0_i32_1 = arith.constant 0 : i32
    return %c0_i32, %c0_i32_0 : i32, i32
  }
  func.func @transform_3(%arg0: i32) -> (i32, i32) {
    %c0_i32 = arith.constant 0 : i32
    %c0_i32_0 = arith.constant 0 : i32
    return %arg0, %c0_i32 : i32, i32
  }
}

module attributes {stable_mosaic.version = 11 : i64} {
  func.func @_head_kernel(%arg0: memref<2x128xbf16, #tpu.memory_space<vmem>>, %arg1: memref<128x256xbf16, #tpu.memory_space<vmem>>, %arg2: memref<1x256xf32, #tpu.memory_space<vmem>>, %arg3: memref<256x128xbf16, #tpu.memory_space<vmem>>, %arg4: memref<1x128xf32, #tpu.memory_space<vmem>>, %arg5: memref<2x128xf32, #tpu.memory_space<vmem>>) attributes {dimension_semantics = [], scalar_prefetch = 0 : i64, scratch_operands = 0 : i64, tpu.core_type = #tpu.core_type<tc>} {
    %c0 = arith.constant 0 : index
    %c0_0 = arith.constant 0 : index
    %0 = vector.load %arg0[%c0, %c0_0] : memref<2x128xbf16, #tpu.memory_space<vmem>>, vector<2x128xbf16>
    %c0_1 = arith.constant 0 : index
    %c0_2 = arith.constant 0 : index
    %1 = vector.load %arg1[%c0_1, %c0_2] : memref<128x256xbf16, #tpu.memory_space<vmem>>, vector<128x256xbf16>
    %cst = arith.constant dense<0.000000e+00> : vector<2x256xf32>
    %2 = tpu.matmul %0, %1, %cst {dimension_numbers = #tpu.dot_dimension_numbers<[1], [0], [0], [1], [0, 0, 1, 1], [], []>} : vector<2x128xbf16>, vector<128x256xbf16>, vector<2x256xf32> -> vector<2x256xf32>
    %c0_3 = arith.constant 0 : index
    %c0_4 = arith.constant 0 : index
    %3 = vector.load %arg2[%c0_3, %c0_4] : memref<1x256xf32, #tpu.memory_space<vmem>>, vector<1x256xf32>
    %4 = vector.broadcast %3 : vector<1x256xf32> to vector<2x256xf32>
    %5 = arith.addf %2, %4 : vector<2x256xf32>
    %cst_5 = arith.constant 0.000000e+00 : f32
    %6 = vector.broadcast %cst_5 : f32 to vector<2x256xf32>
    %7 = arith.maximumf %5, %6 : vector<2x256xf32>
    %8 = arith.truncf %7 : vector<2x256xf32> to vector<2x256xbf16>
    %c0_6 = arith.constant 0 : index
    %c0_7 = arith.constant 0 : index
    %9 = vector.load %arg3[%c0_6, %c0_7] : memref<256x128xbf16, #tpu.memory_space<vmem>>, vector<256x128xbf16>
    %cst_8 = arith.constant dense<0.000000e+00> : vector<2x128xf32>
    %10 = tpu.matmul %8, %9, %cst_8 {dimension_numbers = #tpu.dot_dimension_numbers<[1], [0], [0], [1], [0, 0, 1, 1], [], []>} : vector<2x256xbf16>, vector<256x128xbf16>, vector<2x128xf32> -> vector<2x128xf32>
    %c0_9 = arith.constant 0 : index
    %c0_10 = arith.constant 0 : index
    %11 = vector.load %arg4[%c0_9, %c0_10] : memref<1x128xf32, #tpu.memory_space<vmem>>, vector<1x128xf32>
    %12 = vector.broadcast %11 : vector<1x128xf32> to vector<2x128xf32>
    %13 = arith.addf %10, %12 : vector<2x128xf32>
    %14 = tpu.iota {dimensions = array<i32: 1>} : vector<2x128xi32>
    %c1_i32 = arith.constant 1 : i32
    %15 = vector.broadcast %c1_i32 : i32 to vector<2x128xi32>
    %16 = arith.cmpi sge, %14, %15 : vector<2x128xi32>
    %c4_i32 = arith.constant 4 : i32
    %17 = vector.broadcast %c4_i32 : i32 to vector<2x128xi32>
    %18 = arith.cmpi sle, %14, %17 : vector<2x128xi32>
    %19 = arith.andi %16, %18 : vector<2x128xi1>
    %cst_11 = arith.constant 0.000000e+00 : f32
    %20 = vector.broadcast %cst_11 : f32 to vector<2x128xf32>
    %21 = arith.select %19, %13, %20 : vector<2x128xi1>, vector<2x128xf32>
    %22 = vector.shape_cast %21 : vector<2x128xf32> to vector<1x2x128xf32>
    %cst_12 = arith.constant dense<0.000000e+00> : vector<1xf32>
    %23 = vector.multi_reduction <add>, %22, %cst_12 [1, 2] : vector<1x2x128xf32> to vector<1xf32>
    %24 = vector.shape_cast %23 : vector<1xf32> to vector<1x1x1xf32>
    %25 = vector.extract %24[0, 0, 0] : f32 from vector<1x1x1xf32>
    %cst_13 = arith.constant 1.250000e-01 : f32
    %26 = arith.mulf %25, %cst_13 : f32
    %c0_i32 = arith.constant 0 : i32
    %27 = vector.broadcast %c0_i32 : i32 to vector<2x128xi32>
    %28 = arith.cmpi eq, %14, %27 : vector<2x128xi32>
    %cst_14 = arith.constant 0.000000e+00 : f32
    %29 = vector.broadcast %cst_14 : f32 to vector<2x128xf32>
    %30 = arith.select %28, %13, %29 : vector<2x128xi1>, vector<2x128xf32>
    %cst_15 = arith.constant dense<0.000000e+00> : vector<2xf32>
    %31 = vector.multi_reduction <add>, %30, %cst_15 [1] : vector<2x128xf32> to vector<2xf32>
    %32 = vector.shape_cast %31 : vector<2xf32> to vector<2x1xf32>
    %33 = vector.broadcast %32 : vector<2x1xf32> to vector<2x128xf32>
    %34 = arith.addf %33, %13 : vector<2x128xf32>
    %35 = vector.broadcast %26 : f32 to vector<2x128xf32>
    %36 = arith.subf %34, %35 : vector<2x128xf32>
    %c0_16 = arith.constant 0 : index
    %c0_17 = arith.constant 0 : index
    %37 = vector.load %arg5[%c0_16, %c0_17] : memref<2x128xf32, #tpu.memory_space<vmem>>, vector<2x128xf32>
    tpu.vector_store %arg5[%c0_16, %c0_17], %36 {strides = array<i32>} : memref<2x128xf32, #tpu.memory_space<vmem>>, vector<2x128xf32>,
    return
  }
}

</mosaic_0001>

<bundles_post_ra>
// kernel: forward.4
= control target key start
LH: loop header
LB: loop body
LE: loop exit
PB: predicated region body
PF: predicated region fallthrough
CT: control target
= control target key end

     0   :  { %s900_s1 = inlined_call_operand.vmem [shape: bf16[256,128], index: 1, kind: input, shape index: {}]   ;;  %s901_s0 = inlined_call_operand.vmem [shape: bf16[128,256], index: 0, kind: input, shape index: {}]   ;;  %s902_s3 = inlined_call_operand.<no memory space> [shape: f32[1,1], index: 3, kind: input, shape index: {}]   ;;  %s903_s2 = inlined_call_operand.vmem [shape: f32[1,128], index: 2, kind: input, shape index: {}]   ;;  %s904_s4 = inlined_call_operand.vmem [shape: bf16[128,128], index: 4, kind: output, shape index: {}]  }
   0x1   :  { %v673_v0 = vld [vmem:[%s900_s1 + $0x40] sm:$0xff]   ;;  %v675_v2 = vld [vmem:[%s900_s1 + $0x48] sm:$0xff]   ;;  %v677_v4 = vld [vmem:[%s900_s1 + $0x50] sm:$0xff]   ;;  %v837_v35 = vstv %s902_s3 }
   0x2   :  { %v674_v1 = vld [vmem:[%s900_s1] sm:$0xff]   ;;  %593 = vmatprep.subr.bf16.mxu0 %v673_v0  ;;  %657 = vmatprep.subr.bf16.mxu1 %v673_v0  ;;  %v676_v3 = vld [vmem:[%s900_s1 + $0x8] sm:$0xff]   ;;  %v678_v5 = vld [vmem:[%s900_s1 + $0x10] sm:$0xff]  }
   0x3   :  { %594 = vmatpush3.bf16.msra.mxu0 %v674_v1  ;;  %665 = vmatpush3.bf16.msra.mxu1 %v674_v1  ;;  %v679_v6 = vld [vmem:[%s900_s1 + $0x58] sm:$0xff]   ;;  %v681_v8 = vld [vmem:[%s900_s1 + $0x60] sm:$0xff]   ;;  %v683_v10 = vld [vmem:[%s900_s1 + $0x68] sm:$0xff]  }
   0x4   :  { %595 = vmatprep.subr.bf16.mxu0 %v675_v2  ;;  %658 = vmatprep.subr.bf16.mxu1 %v675_v2  ;;  %v680_v7 = vld [vmem:[%s900_s1 + $0x18] sm:$0xff]   ;;  %v682_v9 = vld [vmem:[%s900_s1 + $0x20] sm:$0xff]   ;;  %v684_v13 = vld [vmem:[%s900_s1 + $0x28] sm:$0xff]  }
   0x5   :  { %v691_v11 = vld [vmem:[%s901_s0 + $0x4] ss:$8 sps:$4 sm:$0xff]   ;;  %v685_v14 = vld [vmem:[%s900_s1 + $0x70] sm:$0xff]   ;;  %v687_v16 = vld [vmem:[%s900_s1 + $0x78] sm:$0xff]  }
   0x6   :  { %v694_v12 = vld [vmem:[%s901_s0 + $0x44] ss:$8 sps:$4 sm:$0xff]   ;;  %275 = vmatprep.mubr.bf16.mxu0 %v691_v11  ;;  %v686_v15 = vld [vmem:[%s900_s1 + $0x30] sm:$0xff]   ;;  %v688_v17 = vld [vmem:[%s900_s1 + $0x38] sm:$0xff]  }
   0x7   :  { %596 = vmatpush3.bf16.msra.mxu0 %v676_v3  ;;  %666 = vmatpush3.bf16.msra.mxu1 %v676_v3  ;;  %v689_v18 = vld [vmem:[%s901_s0] ss:$8 sps:$4 sm:$0xff]   ;;  %v695_v20 = vld [vmem:[%s901_s0 + $0x14] ss:$8 sps:$4 sm:$0xff]   ;;  %v699_v22 = vld [vmem:[%s901_s0 + $0x10] ss:$8 sps:$4 sm:$0xff]  }
   0x8   :  { %597 = vmatprep.subr.bf16.mxu0 %v677_v4  ;;  %659 = vmatprep.subr.bf16.mxu1 %v677_v4  ;;  %v692_v19 = vld [vmem:[%s901_s0 + $0x40] ss:$8 sps:$4 sm:$0xff]   ;;  %v697_v21 = vld [vmem:[%s901_s0 + $0x54] ss:$8 sps:$4 sm:$0xff]   ;;  %v700_v23 = vld [vmem:[%s901_s0 + $0x50] ss:$8 sps:$4 sm:$0xff]  }
   0x9   :  { %307 = vmatprep.mubr.bf16.mxu1 %v694_v12  ;;  %v701_v24 = vld [vmem:[%s901_s0 + $0x24] ss:$8 sps:$4 sm:$0xff]   ;;  %v705_v26 = vld [vmem:[%s901_s0 + $0x20] ss:$8 sps:$4 sm:$0xff]   ;;  %v707_v28 = vld [vmem:[%s901_s0 + $0x34] ss:$8 sps:$4 sm:$0xff]  }
   0xa   :  { %v703_v25 = vld [vmem:[%s901_s0 + $0x64] ss:$8 sps:$4 sm:$0xff]   ;;  %v706_v27 = vld [vmem:[%s901_s0 + $0x60] ss:$8 sps:$4 sm:$0xff]   ;;  %v709_v29 = vld [vmem:[%s901_s0 + $0x74] ss:$8 sps:$4 sm:$0xff]  }
   0xb   :  { %598 = vmatpush3.bf16.msra.mxu0 %v678_v5  ;;  %667 = vmatpush3.bf16.msra.mxu1 %v678_v5  ;;  %v711_v30 = vld [vmem:[%s901_s0 + $0x30] ss:$8 sps:$4 sm:$0xff]   ;;  %v842_v41 = vld [vmem:[%s903_s2] ss:$0 sm:$0xff] }
   0xc   :  { %599 = vmatprep.subr.bf16.mxu0 %v679_v6  ;;  %660 = vmatprep.subr.bf16.mxu1 %v679_v6  ;;  %v712_v31 = vld [vmem:[%s901_s0 + $0x70] ss:$8 sps:$4 sm:$0xff]  }
   0xf   :  { %600 = vmatpush3.bf16.msra.mxu0 %v680_v7  ;;  %668 = vmatpush3.bf16.msra.mxu1 %v680_v7 }
  0x10   :  { %601 = vmatprep.subr.bf16.mxu0 %v681_v8  ;;  %661 = vmatprep.subr.bf16.mxu1 %v681_v8 }
  0x13   :  { %602 = vmatpush3.bf16.msra.mxu0 %v682_v9  ;;  %669 = vmatpush3.bf16.msra.mxu1 %v682_v9 }
  0x14   :  { %603 = vmatprep.subr.bf16.mxu0 %v683_v10  ;;  %662 = vmatprep.subr.bf16.mxu1 %v683_v10 }
  0x17   :  { %604 = vmatpush3.bf16.msra.mxu0 %v684_v13  ;;  %670 = vmatpush3.bf16.msra.mxu1 %v684_v13 }
  0x18   :  { %605 = vmatprep.subr.bf16.mxu0 %v685_v14  ;;  %663 = vmatprep.subr.bf16.mxu1 %v685_v14 }
  0x1b   :  { %606 = vmatpush3.bf16.msra.mxu0 %v686_v15  ;;  %671 = vmatpush3.bf16.msra.mxu1 %v686_v15 }
  0x1c   :  { %607 = vmatprep.subr.bf16.mxu0 %v687_v16  ;;  %664 = vmatprep.subr.bf16.mxu1 %v687_v16 }
  0x1f   :  { %608 = vmatpush3.bf16.msra.mxu0 %v688_v17  ;;  %672 = vmatpush3.bf16.msra.mxu1 %v688_v17 }
  0x22   :  { %276 = vmatmul.mubr.bf16.vlgmr.msra.gmra.mrb[0].mxu0 %v689_v18  ;;  %308 = vmatmul.mubr.bf16.vlgmr.msra.gmra.mrb[0].mxu1 %v692_v19 }
  0x23   :  { %283 = vmatprep.mubr.bf16.mxu0 %v695_v20  ;;  %315 = vmatprep.mubr.bf16.mxu1 %v697_v21 }
  0x2a   :  { %284 = vmatmul.mubr.bf16.gmra.mrb[4].mxu0 %v699_v22  ;;  %316 = vmatmul.mubr.bf16.gmra.mrb[4].mxu1 %v700_v23 }
  0x2b   :  { %291 = vmatprep.mubr.bf16.mxu0 %v701_v24  ;;  %323 = vmatprep.mubr.bf16.mxu1 %v703_v25 }
  0x32   :  { %292 = vmatmul.mubr.bf16.gmra.mrb[8].mxu0 %v705_v26  ;;  %324 = vmatmul.mubr.bf16.gmra.mrb[8].mxu1 %v706_v27 }
  0x33   :  { %299 = vmatprep.mubr.bf16.mxu0 %v707_v28  ;;  %331 = vmatprep.mubr.bf16.mxu1 %v709_v29 }
  0x3a   :  { %300 = vmatmul.mubr.bf16.gmra.mrb[12].mxu0 %v711_v30  ;;  %332 = vmatmul.mubr.bf16.gmra.mrb[12].mxu1 %v712_v31 }
  0xf5   :  { %v609_v32 = vpop.f32.mrb[0].mxu0  ;;  %v633_v33 = vpop.f32.mrb[0].mxu1 }
  0xf6   :  { %v610_v34 = vpop.f32.mrb[1].mxu0  ;;  %v634_v36 = vpop.f32.mrb[1].mxu1 }
  0xf7   :  { %v611_v37 = vadd.f32 %v610_v34, %v609_v32  ;;  %v635_v38 = vadd.f32 %v634_v36, %v633_v33  ;;  %v612_v39 = vpop.f32.mrb[2].mxu0  ;;  %v636_v40 = vpop.f32.mrb[2].mxu1 }
  0xf8   :  { %v613_v42 = vpop.f32.mrb[3].mxu0  ;;  %v637_v43 = vpop.f32.mrb[3].mxu1 }
  0xf9   :  { %v342_v44 = vmul.f32 %v611_v37, %v837_v35  ;;  %v350_v45 = vmul.f32 %v635_v38, %v837_v35  ;;  %v614_v46 = vadd.f32 %v613_v42, %v612_v39  ;;  %v638_v47 = vadd.f32 %v637_v43, %v636_v40 }
  0xfb   :  { %v365_v48 = vadd.f32 %v842_v41, %v342_v44  ;;  %v373_v49 = vadd.f32 %v842_v41, %v350_v45  ;;  %v343_v50 = vmul.f32 %v614_v46, %v837_v35  ;;  %v351_v51 = vmul.f32 %v638_v47, %v837_v35 }
  0xfd   :  { %v366_v52 = vadd.f32 %v842_v41, %v343_v50  ;;  %v374_v53 = vadd.f32 %v842_v41, %v351_v51  ;;  %v615_v54 = vpop.f32.mrb[4].mxu0  ;;  %v639_v55 = vpop.f32.mrb[4].mxu1  ;;  %v381_v56 = vmax.f32 %v365_v48, 0.0  ;;  %v389_v57 = vmax.f32 %v373_v49, 0.0 }
  0xfe   :  { %v616_v58 = vpop.f32.mrb[5].mxu0  ;;  %v640_v59 = vpop.f32.mrb[5].mxu1 }
  0xff   :  { %v382_v60 = vmax.f32 %v366_v52, 0.0  ;;  %v390_v61 = vmax.f32 %v374_v53, 0.0  ;;  %v617_v62 = vadd.f32 %v616_v58, %v615_v54  ;;  %v641_v63 = vadd.f32 %v640_v59, %v639_v55  ;;  %v618_v0 = vpop.f32.mrb[6].mxu0  ;;  %v642_v1 = vpop.f32.mrb[6].mxu1 }
 0x100   :  { %v619_v2 = vpop.f32.mrb[7].mxu0  ;;  %v643_v3 = vpop.f32.mrb[7].mxu1 }
 0x101   :  { %v549_v4 = vpack.c.bf16 %v382_v60, %v381_v56  ;;  %v569_v5 = vpack.c.bf16 %v390_v61, %v389_v57  ;;  %v344_v6 = vmul.f32 %v617_v62, %v837_v35  ;;  %v352_v7 = vmul.f32 %v641_v63, %v837_v35 }
 0x102   :  { %v620_v8 = vadd.f32 %v619_v2, %v618_v0  ;;  %v644_v9 = vadd.f32 %v643_v3, %v642_v1 }
 0x103   :  { %550 = vst [vmem:[%s904_s4] sm:$0xff] %v549_v4   ;;  %589 = vst [vmem:[%s904_s4 + $0x20] sm:$0xff] %v569_v5   ;;  %v367_v10 = vadd.f32 %v842_v41, %v344_v6  ;;  %v375_v11 = vadd.f32 %v842_v41, %v352_v7 }
 0x104   :  { %v345_v12 = vmul.f32 %v620_v8, %v837_v35  ;;  %v353_v13 = vmul.f32 %v644_v9, %v837_v35 }
 0x105   :  { %v621_v14 = vpop.f32.mrb[8].mxu0  ;;  %v645_v15 = vpop.f32.mrb[8].mxu1  ;;  %v383_v24 = vmax.f32 %v367_v10, 0.0  ;;  %v391_v25 = vmax.f32 %v375_v11, 0.0 }
 0x106   :  { %v368_v16 = vadd.f32 %v842_v41, %v345_v12  ;;  %v376_v17 = vadd.f32 %v842_v41, %v353_v13  ;;  %v622_v18 = vpop.f32.mrb[9].mxu0  ;;  %v646_v19 = vpop.f32.mrb[9].mxu1 }
 0x107   :  { %v623_v20 = vadd.f32 %v622_v18, %v621_v14  ;;  %v647_v21 = vadd.f32 %v646_v19, %v645_v15  ;;  %v624_v22 = vpop.f32.mrb[10].mxu0  ;;  %v648_v23 = vpop.f32.mrb[10].mxu1 }
 0x108   :  { %v384_v26 = vmax.f32 %v368_v16, 0.0  ;;  %v392_v27 = vmax.f32 %v376_v17, 0.0  ;;  %v625_v28 = vpop.f32.mrb[11].mxu0  ;;  %v649_v29 = vpop.f32.mrb[11].mxu1 }
 0x109   :  { %v346_v30 = vmul.f32 %v623_v20, %v837_v35  ;;  %v354_v31 = vmul.f32 %v647_v21, %v837_v35  ;;  %v626_v32 = vadd.f32 %v625_v28, %v624_v22  ;;  %v650_v33 = vadd.f32 %v649_v29, %v648_v23 }
 0x10a   :  { %v554_v34 = vpack.c.bf16 %v384_v26, %v383_v24  ;;  %v574_v36 = vpack.c.bf16 %v392_v27, %v391_v25 }
 0x10b   :  { %v369_v37 = vadd.f32 %v842_v41, %v346_v30  ;;  %v377_v38 = vadd.f32 %v842_v41, %v354_v31  ;;  %v347_v39 = vmul.f32 %v626_v32, %v837_v35  ;;  %v355_v40 = vmul.f32 %v650_v33, %v837_v35 }
 0x10c   :  { %586 = vst [vmem:[%s904_s4 + $0x8] sm:$0xff] %v554_v34   ;;  %590 = vst [vmem:[%s904_s4 + $0x28] sm:$0xff] %v574_v36  }
 0x10d   :  { %v370_v42 = vadd.f32 %v842_v41, %v347_v39  ;;  %v378_v43 = vadd.f32 %v842_v41, %v355_v40  ;;  %v627_v44 = vpop.f32.mrb[12].mxu0  ;;  %v651_v45 = vpop.f32.mrb[12].mxu1  ;;  %v385_v46 = vmax.f32 %v369_v37, 0.0  ;;  %v393_v47 = vmax.f32 %v377_v38, 0.0 }
 0x10e   :  { %v628_v48 = vpop.f32.mrb[13].mxu0  ;;  %v652_v49 = vpop.f32.mrb[13].mxu1 }
 0x10f   :  { %v386_v50 = vmax.f32 %v370_v42, 0.0  ;;  %v394_v51 = vmax.f32 %v378_v43, 0.0  ;;  %v629_v52 = vadd.f32 %v628_v48, %v627_v44  ;;  %v653_v53 = vadd.f32 %v652_v49, %v651_v45  ;;  %v630_v54 = vpop.f32.mrb[14].mxu0  ;;  %v654_v55 = vpop.f32.mrb[14].mxu1 }
 0x110   :  { %v631_v56 = vpop.f32.mrb[15].mxu0  ;;  %v655_v57 = vpop.f32.mrb[15].mxu1 }
 0x111   :  { %v559_v58 = vpack.c.bf16 %v386_v50, %v385_v46  ;;  %v579_v59 = vpack.c.bf16 %v394_v51, %v393_v47  ;;  %v348_v60 = vmul.f32 %v629_v52, %v837_v35  ;;  %v356_v61 = vmul.f32 %v653_v53, %v837_v35 }
 0x112   :  { %v632_v62 = vadd.f32 %v631_v56, %v630_v54  ;;  %v656_v63 = vadd.f32 %v655_v57, %v654_v55 }
 0x113   :  { %587 = vst [vmem:[%s904_s4 + $0x10] sm:$0xff] %v559_v58   ;;  %591 = vst [vmem:[%s904_s4 + $0x30] sm:$0xff] %v579_v59   ;;  %v371_v0 = vadd.f32 %v842_v41, %v348_v60  ;;  %v379_v1 = vadd.f32 %v842_v41, %v356_v61 }
 0x114   :  { %v349_v2 = vmul.f32 %v632_v62, %v837_v35  ;;  %v357_v3 = vmul.f32 %v656_v63, %v837_v35 }
 0x115   :  { %v387_v6 = vmax.f32 %v371_v0, 0.0  ;;  %v395_v7 = vmax.f32 %v379_v1, 0.0 }
 0x116   :  { %v372_v4 = vadd.f32 %v842_v41, %v349_v2  ;;  %v380_v5 = vadd.f32 %v842_v41, %v357_v3 }
 0x118   :  { %v388_v8 = vmax.f32 %v372_v4, 0.0  ;;  %v396_v9 = vmax.f32 %v380_v5, 0.0 }
 0x11a   :  { %v564_v10 = vpack.c.bf16 %v388_v8, %v387_v6  ;;  %v584_v11 = vpack.c.bf16 %v396_v9, %v395_v7 }
 0x11c   :  { %588 = vst [vmem:[%s904_s4 + $0x18] sm:$0xff] %v564_v10   ;;  %592 = vst [vmem:[%s904_s4 + $0x38] sm:$0xff] %v584_v11  }

// kernel: forward.6
= control target key start
LH: loop header
LB: loop body
LE: loop exit
PB: predicated region body
PF: predicated region fallthrough
CT: control target
= control target key end

     0   :  { %v1148_v21 = vmov 1966171168   ;;  %v174_v23 = vlaneseq  ;;  %vm1150_vm0 = vmmov 0   ;;  %s1413_s1 = inlined_call_operand.vmem [shape: bf16[1152,128], index: 1, kind: input, shape index: {}]   ;;  %s1414_s0 = inlined_call_operand.vmem [shape: bf16[2,1152], index: 0, kind: input, shape index: {}]   ;;  %s1415_s2 = inlined_call_operand.vmem [shape: f32[1,128], index: 2, kind: input, shape index: {}]   ;;  %s1416_s3 = inlined_call_operand.vmem [shape: bf16[2,128], index: 3, kind: output, shape index: {}]  }
   0x1   :  { %v1075_v0 = vld [vmem:[%s1413_s1 + $0x40] sm:$0xff]   ;;  %v1079_v4 = vld [vmem:[%s1413_s1 + $0x48] sm:$0xff]   ;;  %v1083_v8 = vld [vmem:[%s1413_s1 + $0x50] sm:$0xff]   ;;  %v172_v22 = vunpack.c.l.s4 %v1148_v21 }
   0x2   :  { %v1076_v1 = vld [vmem:[%s1413_s1] sm:$0xff]   ;;  %955 = vmatprep.subr.bf16.mxu0 %v1075_v0  ;;  %v1080_v5 = vld [vmem:[%s1413_s1 + $0x8] sm:$0xff]   ;;  %v1084_v9 = vld [vmem:[%s1413_s1 + $0x10] sm:$0xff]   ;;  %v175_v29 = vshrl.u32 %v174_v23, 7 }
   0x3   :  { %v1077_v2 = vld [vmem:[%s1413_s1 + $0xc0] sm:$0xff]   ;;  %956 = vmatpush3.bf16.msra.mxu0 %v1076_v1  ;;  %v1081_v6 = vld [vmem:[%s1413_s1 + $0xc8] sm:$0xff]   ;;  %v1085_v10 = vld [vmem:[%s1413_s1 + $0xd0] sm:$0xff]   ;;  %v173_v28 = vunpack.c.0.s8 %v172_v22 }
   0x4   :  { %v1078_v3 = vld [vmem:[%s1413_s1 + $0x80] sm:$0xff]   ;;  %977 = vmatprep.subr.bf16.mxu1 %v1077_v2  ;;  %957 = vmatprep.subr.bf16.mxu0 %v1079_v4  ;;  %v1082_v7 = vld [vmem:[%s1413_s1 + $0x88] sm:$0xff]   ;;  %v1086_v11 = vld [vmem:[%s1413_s1 + $0x90] sm:$0xff]  }
   0x5   :  { %978 = vmatpush3.bf16.msra.mxu1 %v1078_v3  ;;  %v1087_v12 = vld [vmem:[%s1413_s1 + $0x58] sm:$0xff]   ;;  %v1091_v16 = vld [vmem:[%s1413_s1 + $0x60] sm:$0xff]   ;;  %v1095_v20 = vld [vmem:[%s1413_s1 + $0x68] sm:$0xff]   ;;  %v1258_v34 = vsub.s32 %v173_v28, %v175_v29 }
   0x6   :  { %979 = vmatprep.subr.bf16.mxu1 %v1081_v6  ;;  %v1088_v13 = vld [vmem:[%s1413_s1 + $0x18] sm:$0xff]   ;;  %v1092_v17 = vld [vmem:[%s1413_s1 + $0x20] sm:$0xff]   ;;  %v1096_v24 = vld [vmem:[%s1413_s1 + $0x28] sm:$0xff]  }
   0x7   :  { %958 = vmatpush3.bf16.msra.mxu0 %v1080_v5  ;;  %v1089_v14 = vld [vmem:[%s1413_s1 + $0xd8] sm:$0xff]   ;;  %v1093_v18 = vld [vmem:[%s1413_s1 + $0xe0] sm:$0xff]   ;;  %v1097_v25 = vld [vmem:[%s1413_s1 + $0xe8] sm:$0xff]  }
   0x8   :  { %959 = vmatprep.subr.bf16.mxu0 %v1083_v8  ;;  %v1090_v15 = vld [vmem:[%s1413_s1 + $0x98] sm:$0xff]   ;;  %v1094_v19 = vld [vmem:[%s1413_s1 + $0xa0] sm:$0xff]   ;;  %v1098_v26 = vld [vmem:[%s1413_s1 + $0xa8] sm:$0xff]  }
   0x9   :  { %980 = vmatpush3.bf16.msra.mxu1 %v1082_v7  ;;  %v1099_v27 = vld [vmem:[%s1413_s1 + $0x70] sm:$0xff]   ;;  %v1103_v33 = vld [vmem:[%s1413_s1 + $0x78] sm:$0xff]   ;;  %v15_v37 = vld [vmem:[%s1414_s0] sm:$0xff] }
   0xa   :  { %981 = vmatprep.subr.bf16.mxu1 %v1085_v10  ;;  %v1100_v30 = vld [vmem:[%s1413_s1 + $0x30] sm:$0xff]   ;;  %v1104_v35 = vld [vmem:[%s1413_s1 + $0x38] sm:$0xff]   ;;  %v170_v38 = vcombine.high %v15_v37, %v15_v37  ;;  %v177_v39 = vrot.slane %v15_v37, %v1258_v34  ;;  %v1108_v41 = vld [vmem:[%s1413_s1 + $0x140] sm:$0xff]  }
   0xb   :  { %960 = vmatpush3.bf16.msra.mxu0 %v1084_v9  ;;  %v1101_v31 = vld [vmem:[%s1413_s1 + $0xf0] sm:$0xff]   ;;  %v1105_v36 = vld [vmem:[%s1413_s1 + $0xf8] sm:$0xff]   ;;  %v1110_v45 = vld [vmem:[%s1413_s1 + $0x1c0] sm:$0xff]  }
   0xc   :  { %961 = vmatprep.subr.bf16.mxu0 %v1087_v12  ;;  %v1102_v32 = vld [vmem:[%s1413_s1 + $0xb0] sm:$0xff]   ;;  %v1107_v40 = vld [vmem:[%s1413_s1 + $0xb8] sm:$0xff]   ;;  %v185_v42 = vcombine.high %v177_v39, %v177_v39  ;;  %v193_v43 = vrot.slane %v177_v39, %v1258_v34  ;;  %v1278_v44 = vrot.slane %v170_v38, %v1258_v34  ;;  %v1109_v47 = vld [vmem:[%s1413_s1 + $0x100] sm:$0xff]  }
   0xd   :  { %982 = vmatpush3.bf16.msra.mxu1 %v1086_v11  ;;  %v1112_v50 = vld [vmem:[%s1413_s1 + $0x148] sm:$0xff]   ;;  %v1111_v52 = vld [vmem:[%s1413_s1 + $0x180] sm:$0xff]   ;;  %v1116_v57 = vld [vmem:[%s1413_s1 + $0x150] sm:$0xff]  }
   0xe   :  { %983 = vmatprep.subr.bf16.mxu1 %v1089_v14  ;;  %v207_v46 = vrot.slane %v185_v42, %v1258_v34  ;;  %v186_v48 = vcombine.high %v1278_v44, %v1278_v44  ;;  %v215_v49 = vcombine.high %v193_v43, %v193_v43  ;;  %v1114_v54 = vld [vmem:[%s1413_s1 + $0x1c8] sm:$0xff]   ;;  %v1118_v59 = vld [vmem:[%s1413_s1 + $0x1d0] sm:$0xff]   ;;  %v1120_v61 = vld [vmem:[%s1413_s1 + $0x158] sm:$0xff]  }
   0xf   :  { %962 = vmatpush3.bf16.msra.mxu0 %v1088_v13  ;;  %v1113_v55 = vld [vmem:[%s1413_s1 + $0x108] sm:$0xff]   ;;  %v1117_v60 = vld [vmem:[%s1413_s1 + $0x110] sm:$0xff]   ;;  %v1122_v63 = vld [vmem:[%s1413_s1 + $0x1d8] sm:$0xff]  }
  0x10   :  { %963 = vmatprep.subr.bf16.mxu0 %v1091_v16  ;;  %706 = vmatprep.mubr.bf16.mxu0 %v207_v46  ;;  %v217_v51 = vcombine.high %v207_v46, %v207_v46  ;;  %v214_v53 = vrot.slane %v186_v48, %v1258_v34  ;;  %v1115_v58 = vld [vmem:[%s1413_s1 + $0x188] sm:$0xff]   ;;  %v1119_v62 = vld [vmem:[%s1413_s1 + $0x190] sm:$0xff]   ;;  %v1121_v0 = vld [vmem:[%s1413_s1 + $0x118] sm:$0xff]  }
  0x11   :  { %984 = vmatpush3.bf16.msra.mxu1 %v1090_v15  ;;  %v1124_v1 = vld [vmem:[%s1413_s1 + $0x160] sm:$0xff]   ;;  %v1123_v2 = vld [vmem:[%s1413_s1 + $0x198] sm:$0xff]   ;;  %v1128_v5 = vld [vmem:[%s1413_s1 + $0x168] sm:$0xff]  }
  0x12   :  { %985 = vmatprep.subr.bf16.mxu1 %v1093_v18  ;;  %746 = vmatprep.mubr.bf16.mxu1 %v217_v51  ;;  %v218_v56 = vcombine.high %v214_v53, %v214_v53  ;;  %v1126_v3 = vld [vmem:[%s1413_s1 + $0x1e0] sm:$0xff]   ;;  %v1130_v7 = vld [vmem:[%s1413_s1 + $0x1e8] sm:$0xff]   ;;  %v1132_v9 = vld [vmem:[%s1413_s1 + $0x170] sm:$0xff]  }
  0x13   :  { %964 = vmatpush3.bf16.msra.mxu0 %v1092_v17  ;;  %v1125_v4 = vld [vmem:[%s1413_s1 + $0x120] sm:$0xff]   ;;  %v1129_v8 = vld [vmem:[%s1413_s1 + $0x128] sm:$0xff]   ;;  %v1134_v11 = vld [vmem:[%s1413_s1 + $0x1f0] sm:$0xff]   ;;  %v200_v17 = vrot.slane %v1278_v44, %v1258_v34 }
  0x14   :  { %965 = vmatprep.subr.bf16.mxu0 %v1095_v20  ;;  %v1127_v6 = vld [vmem:[%s1413_s1 + $0x1a0] sm:$0xff]   ;;  %v1131_v10 = vld [vmem:[%s1413_s1 + $0x1a8] sm:$0xff]   ;;  %v1133_v12 = vld [vmem:[%s1413_s1 + $0x130] sm:$0xff]   ;;  %v1149_v20 = vmov 0.0  }
  0x15   :  { %986 = vmatpush3.bf16.msra.mxu1 %v1094_v19  ;;  %v1136_v13 = vld [vmem:[%s1413_s1 + $0x178] sm:$0xff]   ;;  %v1135_v14 = vld [vmem:[%s1413_s1 + $0x1b0] sm:$0xff]   ;;  %v1140_v19 = vld [vmem:[%s1413_s1 + $0x200] sm:$0xff]   ;;  %v216_v21 = vcombine.high %v200_v17, %v200_v17 }
  0x16   :  { %987 = vmatprep.subr.bf16.mxu1 %v1097_v25  ;;  %v1138_v15 = vld [vmem:[%s1413_s1 + $0x1f8] sm:$0xff]   ;;  %v1141_v22 = vld [vmem:[%s1413_s1 + $0x208] sm:$0xff]   ;;  %v1142_v25 = vld [vmem:[%s1413_s1 + $0x210] sm:$0xff]  }
  0x17   :  { %966 = vmatpush3.bf16.msra.mxu0 %v1096_v24  ;;  %v1137_v16 = vld [vmem:[%s1413_s1 + $0x138] sm:$0xff]   ;;  %v882_v23 = vld.sshfl [vmem:[%s1414_s0 + $0x8] sm:$0x1 pattern:$0x75316420]  ;;  %v1146_v29 = vld [vmem:[%s1413_s1 + $0x230] sm:$0xff]  }
  0x18   :  { %967 = vmatprep.subr.bf16.mxu0 %v1099_v27  ;;  %v1139_v18 = vld [vmem:[%s1413_s1 + $0x1b8] sm:$0xff]   ;;  %v232_v24 = vrot.slane %v882_v23, %v1258_v34  ;;  %v1144_v27 = vld [vmem:[%s1413_s1 + $0x220] sm:$0xff]   ;;  %v1145_v28 = vld [vmem:[%s1413_s1 + $0x228] sm:$0xff]  }
  0x19   :  { %988 = vmatpush3.bf16.msra.mxu1 %v1098_v26  ;;  %v1143_v26 = vld [vmem:[%s1413_s1 + $0x218] sm:$0xff]  }
  0x1a   :  { %989 = vmatprep.subr.bf16.mxu1 %v1101_v31 }
  0x1b   :  { %968 = vmatpush3.bf16.msra.mxu0 %v1100_v30  ;;  %v1147_v30 = vld [vmem:[%s1413_s1 + $0x238] sm:$0xff]  }
  0x1c   :  { %969 = vmatprep.subr.bf16.mxu0 %v1103_v33 }
  0x1d   :  { %990 = vmatpush3.bf16.msra.mxu1 %v1102_v32  ;;  %v881_v32 = vld [vmem:[%s1415_s2] ss:$0 sm:$0xff] }
  0x1e   :  { %991 = vmatprep.subr.bf16.mxu1 %v1105_v36 }
  0x1f   :  { %970 = vmatpush3.bf16.msra.mxu0 %v1104_v35 }
  0x20   :  { %999 = vmatprep.subr.bf16.mxu0 %v1108_v41 }
  0x21   :  { %992 = vmatpush3.bf16.msra.mxu1 %v1107_v40 }
  0x22   :  { %1021 = vmatprep.subr.bf16.mxu1 %v1110_v45  ;;  %707 = vmatmul.mubr.bf16.vlgmr.msra.gmra.mrb[0].mxu0 %v193_v43 }
  0x23   :  { %1000 = vmatpush3.bf16.msra.mxu0 %v1109_v47  ;;  %786 = vmatprep.mubr.bf16.mxu0 %v214_v53 }
  0x24   :  { %747 = vmatmul.mubr.bf16.vlgmr.msra.gmra.mrb[0].mxu1 %v215_v49  ;;  %1001 = vmatprep.subr.bf16.mxu0 %v1112_v50 }
  0x25   :  { %1022 = vmatpush3.bf16.msra.mxu1 %v1111_v52  ;;  %826 = vmatprep.mubr.bf16.mxu1 %v218_v56 }
  0x26   :  { %1023 = vmatprep.subr.bf16.mxu1 %v1114_v54 }
  0x27   :  { %1002 = vmatpush3.bf16.msra.mxu0 %v1113_v55 }
  0x28   :  { %1003 = vmatprep.subr.bf16.mxu0 %v1116_v57 }
  0x29   :  { %1024 = vmatpush3.bf16.msra.mxu1 %v1115_v58 }
  0x2a   :  { %1025 = vmatprep.subr.bf16.mxu1 %v1118_v59 }
  0x2b   :  { %1004 = vmatpush3.bf16.msra.mxu0 %v1117_v60 }
  0x2c   :  { %1005 = vmatprep.subr.bf16.mxu0 %v1120_v61 }
  0x2d   :  { %1026 = vmatpush3.bf16.msra.mxu1 %v1119_v62 }
  0x2e   :  { %1027 = vmatprep.subr.bf16.mxu1 %v1122_v63 }
  0x2f   :  { %1006 = vmatpush3.bf16.msra.mxu0 %v1121_v0 }
  0x30   :  { %1007 = vmatprep.subr.bf16.mxu0 %v1124_v1 }
  0x31   :  { %1028 = vmatpush3.bf16.msra.mxu1 %v1123_v2 }
  0x32   :  { %1029 = vmatprep.subr.bf16.mxu1 %v1126_v3 }
  0x33   :  { %1008 = vmatpush3.bf16.msra.mxu0 %v1125_v4 }
  0x34   :  { %1009 = vmatprep.subr.bf16.mxu0 %v1128_v5 }
  0x35   :  { %1030 = vmatpush3.bf16.msra.mxu1 %v1127_v6 }
  0x36   :  { %1031 = vmatprep.subr.bf16.mxu1 %v1130_v7 }
  0x37   :  { %1010 = vmatpush3.bf16.msra.mxu0 %v1129_v8 }
  0x38   :  { %1011 = vmatprep.subr.bf16.mxu0 %v1132_v9 }
  0x39   :  { %1032 = vmatpush3.bf16.msra.mxu1 %v1131_v10 }
  0x3a   :  { %1033 = vmatprep.subr.bf16.mxu1 %v1134_v11 }
  0x3b   :  { %1012 = vmatpush3.bf16.msra.mxu0 %v1133_v12 }
  0x3c   :  { %1013 = vmatprep.subr.bf16.mxu0 %v1136_v13 }
  0x3d   :  { %1034 = vmatpush3.bf16.msra.mxu1 %v1135_v14 }
  0x3e   :  { %1035 = vmatprep.subr.bf16.mxu1 %v1138_v15 }
  0x3f   :  { %1014 = vmatpush3.bf16.msra.mxu0 %v1137_v16 }
  0x40   :  { %1052 = vmatprep.subr.bf16.mxu0 %v1149_v20 }
  0x41   :  { %1036 = vmatpush3.bf16.msra.mxu1 %v1139_v18 }
  0x42   :  { %787 = vmatmul.mubr.bf16.vlgmr.msra.gmra.mrb[4].mxu0 %v200_v17 }
  0x43   :  { %1053 = vmatpush3.bf16.msra.mxu0 %v1140_v19  ;;  %1068 = vmatprep.mubr.msk.bf16.mxu0 %vm1150_vm0, %v1149_v20 }
  0x44   :  { %827 = vmatmul.mubr.bf16.vlgmr.msra.gmra.mrb[4].mxu1 %v216_v21  ;;  %1054 = vmatprep.subr.bf16.mxu0 %v1149_v20 }
  0x47   :  { %1055 = vmatpush3.bf16.msra.mxu0 %v1141_v22 }
  0x48   :  { %1056 = vmatprep.subr.bf16.mxu0 %v1149_v20 }
  0x4b   :  { %1057 = vmatpush3.bf16.msra.mxu0 %v1142_v25 }
  0x4c   :  { %1058 = vmatprep.subr.bf16.mxu0 %v1149_v20 }
  0x4f   :  { %1059 = vmatpush3.bf16.msra.mxu0 %v1143_v26 }
  0x50   :  { %1060 = vmatprep.subr.bf16.mxu0 %v1149_v20 }
  0x53   :  { %1061 = vmatpush3.bf16.msra.mxu0 %v1144_v27 }
  0x54   :  { %1062 = vmatprep.subr.bf16.mxu0 %v1149_v20 }
  0x57   :  { %1063 = vmatpush3.bf16.msra.mxu0 %v1145_v28 }
  0x58   :  { %1064 = vmatprep.subr.bf16.mxu0 %v1149_v20 }
  0x5b   :  { %1065 = vmatpush3.bf16.msra.mxu0 %v1146_v29 }
  0x5c   :  { %1066 = vmatprep.subr.bf16.mxu0 %v1149_v20 }
  0x5f   :  { %1067 = vmatpush3.bf16.msra.mxu0 %v1147_v30 }
  0x62   :  { %1069 = vmatmul.mubr.bf16.vlgmr.msra.gmra.mrb[8].mxu0 %v232_v24 }
  0xf5   :  { %v971_v31 = vpop.f32.mrb[0].mxu0 }
  0xf6   :  { %v972_v33 = vpop.f32.mrb[1].mxu0 }
  0xf7   :  { %v973_v34 = vadd.f32 %v972_v33, %v971_v31  ;;  %v974_v35 = vpop.f32.mrb[2].mxu0  ;;  %v993_v36 = vpop.f32.mrb[0].mxu1 }
  0xf8   :  { %v975_v37 = vpop.f32.mrb[3].mxu0  ;;  %v994_v38 = vpop.f32.mrb[1].mxu1 }
  0xf9   :  { %v709_v39 = vadd.f32 %v973_v34, %v881_v32  ;;  %v995_v40 = vadd.f32 %v994_v38, %v993_v36  ;;  %v996_v41 = vpop.f32.mrb[2].mxu1 }
  0xfa   :  { %v997_v42 = vpop.f32.mrb[3].mxu1 }
  0xfb   :  { %v749_v43 = vadd.f32 %v995_v40, %v709_v39 }
 0x115   :  { %v1015_v44 = vpop.f32.mrb[4].mxu0 }
 0x116   :  { %v1016_v45 = vpop.f32.mrb[5].mxu0 }
 0x117   :  { %v1017_v46 = vadd.f32 %v1016_v45, %v1015_v44  ;;  %v1018_v47 = vpop.f32.mrb[6].mxu0  ;;  %v1037_v48 = vpop.f32.mrb[4].mxu1 }
 0x118   :  { %v1019_v49 = vpop.f32.mrb[7].mxu0  ;;  %v1038_v50 = vpop.f32.mrb[5].mxu1 }
 0x119   :  { %v789_v51 = vadd.f32 %v1017_v46, %v749_v43  ;;  %v1039_v52 = vadd.f32 %v1038_v50, %v1037_v48  ;;  %v1040_v53 = vpop.f32.mrb[6].mxu1 }
 0x11a   :  { %v1041_v54 = vpop.f32.mrb[7].mxu1 }
 0x11b   :  { %v829_v55 = vadd.f32 %v1039_v52, %v789_v51 }
 0x135   :  { %v868_v56 = vpop.f32.mrb[8].mxu0 }
 0x136   :  { %v869_v57 = vadd.f32 %v868_v56, %v829_v55  ;;  %v1070_v58 = vpop.f32.mrb[9].mxu0 }
 0x137   :  { %v871_v59 = vpop.f32.mrb[10].mxu0 }
 0x138   :  { %v874_v60 = vmax.f32 %v869_v57, 0.0  ;;  %v1071_v61 = vpop.f32.mrb[11].mxu0 }
 0x13a   :  { %v875_v62 = vpack.c.bf16 %v874_v60, %v874_v60 }
 0x13c   :  { %876 = vst [vmem:[%s1416_s3] sm:$0x1] %v875_v62 }

// kernel: forward.7
= control target key start
LH: loop header
LB: loop body
LE: loop exit
PB: predicated region body
PF: predicated region fallthrough
CT: control target
= control target key end

     0   :  { %v479_v1 = vmov 0   ;;  %v40_v34 = vlaneseq  ;;  %vm356_vm3 = vcmask 1041408   ;;  %s618_s1 = inlined_call_operand.vmem [shape: bf16[128,256], index: 1, kind: input, shape index: {}]   ;;  %s619_s3 = inlined_call_operand.vmem [shape: bf16[256,128], index: 3, kind: input, shape index: {}]   ;;  %s620_s0 = inlined_call_operand.vmem [shape: bf16[2,128], index: 0, kind: input, shape index: {}]   ;;  %s621_s2 = inlined_call_operand.vmem [shape: f32[1,256], index: 2, kind: input, shape index: {}]   ;;  %s622_s4 = inlined_call_operand.vmem [shape: f32[1,128], index: 4, kind: input, shape index: {}]   ;;  %s623_s5 = inlined_call_operand.vmem [shape: f32[2,128], index: 5, kind: output, shape index: {}]  }
   0x1   :  { %v439_v0 = vld [vmem:[%s618_s1 + $0x4] ss:$8 sps:$4 sm:$0xff]   ;;  %162 = vmatprep.mubr.bf16.mxu0 %v479_v1  ;;  %v441_v2 = vld [vmem:[%s618_s1] ss:$8 sps:$4 sm:$0xff]   ;;  %v442_v3 = vld [vmem:[%s618_s1 + $0x14] ss:$8 sps:$4 sm:$0xff]  }
   0x2   :  { %130 = vmatprep.subr.bf16.mxu0 %v439_v0  ;;  %v444_v4 = vld [vmem:[%s618_s1 + $0x10] ss:$8 sps:$4 sm:$0xff]   ;;  %v445_v5 = vld [vmem:[%s618_s1 + $0x24] ss:$8 sps:$4 sm:$0xff]   ;;  %v447_v6 = vld [vmem:[%s618_s1 + $0x20] ss:$8 sps:$4 sm:$0xff]  }
   0x3   :  { %131 = vmatpush1.bf16.msra.mxu0 %v441_v2  ;;  %v448_v7 = vld [vmem:[%s618_s1 + $0x34] ss:$8 sps:$4 sm:$0xff]   ;;  %v450_v8 = vld [vmem:[%s618_s1 + $0x30] ss:$8 sps:$4 sm:$0xff]   ;;  %v451_v9 = vld [vmem:[%s618_s1 + $0x44] ss:$8 sps:$4 sm:$0xff]  }
   0x4   :  { %132 = vmatprep.subr.bf16.mxu0 %v442_v3  ;;  %v463_v10 = vld [vmem:[%s619_s3 + $0x40] sm:$0xff]   ;;  %v465_v13 = vld [vmem:[%s619_s3 + $0x48] sm:$0xff]   ;;  %v467_v15 = vld [vmem:[%s619_s3 + $0x50] sm:$0xff]   ;;  %v41_v35 = vshrl.u32 %v40_v34, 7  ;;  %v351_v51 = vand.u32 127, %v40_v34 }
   0x5   :  { %v464_v11 = vld [vmem:[%s619_s3] sm:$0xff]   ;;  %414 = vmatprep.subr.bf16.mxu1 %v463_v10  ;;  %v466_v14 = vld [vmem:[%s619_s3 + $0x8] sm:$0xff]   ;;  %v454_v16 = vld [vmem:[%s618_s1 + $0x54] ss:$8 sps:$4 sm:$0xff]  }
   0x6   :  { %v453_v12 = vld [vmem:[%s618_s1 + $0x40] ss:$8 sps:$4 sm:$0xff]   ;;  %415 = vmatpush3.bf16.msra.mxu1 %v464_v11  ;;  %v456_v17 = vld [vmem:[%s618_s1 + $0x50] ss:$8 sps:$4 sm:$0xff]   ;;  %v457_v20 = vld [vmem:[%s618_s1 + $0x64] ss:$8 sps:$4 sm:$0xff]  }
   0x7   :  { %133 = vmatpush1.bf16.msra.mxu0 %v444_v4  ;;  %416 = vmatprep.subr.bf16.mxu1 %v465_v13  ;;  %v468_v18 = vld [vmem:[%s619_s3 + $0x10] sm:$0xff]   ;;  %v469_v19 = vld [vmem:[%s619_s3 + $0x58] sm:$0xff]   ;;  %v459_v21 = vld [vmem:[%s618_s1 + $0x60] ss:$8 sps:$4 sm:$0xff]   ;;  %v42_v36 = vsub.s32 0, %v41_v35  ;;  %v46_v38 = vsub.s32 1, %v41_v35 }
   0x8   :  { %134 = vmatprep.subr.bf16.mxu0 %v445_v5  ;;  %v460_v22 = vld [vmem:[%s618_s1 + $0x74] ss:$8 sps:$4 sm:$0xff]   ;;  %v471_v24 = vld [vmem:[%s619_s3 + $0x60] sm:$0xff]   ;;  %v462_v26 = vld [vmem:[%s618_s1 + $0x70] ss:$8 sps:$4 sm:$0xff]   ;;  %vm352_vm0 = vcmp.ge.s32.totalorder %v351_v51, 1 }
   0x9   :  { %v470_v23 = vld [vmem:[%s619_s3 + $0x18] sm:$0xff]   ;;  %v472_v25 = vld [vmem:[%s619_s3 + $0x20] sm:$0xff]   ;;  %v473_v27 = vld [vmem:[%s619_s3 + $0x68] sm:$0xff]   ;;  %vm353_vm1 = vcmp.le.s32.totalorder %v351_v51, 4  ;;  %vm368_vm4 = vcmp.eq.s32.totalorder %v351_v51, 0 }
   0xa   :  { %417 = vmatpush3.bf16.msra.mxu1 %v466_v14  ;;  %v474_v28 = vld [vmem:[%s619_s3 + $0x28] sm:$0xff]   ;;  %v21_v29 = vld [vmem:[%s620_s0] sm:$0x1]  ;;  %v475_v30 = vld [vmem:[%s619_s3 + $0x70] sm:$0xff]  }
   0xb   :  { %135 = vmatpush1.bf16.msra.mxu0 %v447_v6  ;;  %418 = vmatprep.subr.bf16.mxu1 %v467_v15  ;;  %v476_v31 = vld [vmem:[%s619_s3 + $0x30] sm:$0xff]   ;;  %v477_v32 = vld [vmem:[%s619_s3 + $0x78] sm:$0xff]   ;;  %v38_v37 = vld [vmem:[%s621_s2] sm:$0x3] }
   0xc   :  { %136 = vmatprep.subr.bf16.mxu0 %v448_v7  ;;  %v478_v33 = vld [vmem:[%s619_s3 + $0x38] sm:$0xff]   ;;  %v43_v39 = vrot.slane %v38_v37, %v42_v36  ;;  %v47_v40 = vrot.slane %v38_v37, %v46_v38  ;;  %v397_v53 = vld [vmem:[%s622_s4] ss:$0 sm:$0xff]  ;;  %vm354_vm2 = vmand %vm352_vm0, %vm353_vm1 }
   0xe   :  { %419 = vmatpush3.bf16.msra.mxu1 %v468_v18 }
   0xf   :  { %137 = vmatpush1.bf16.msra.mxu0 %v450_v8  ;;  %420 = vmatprep.subr.bf16.mxu1 %v469_v19 }
  0x10   :  { %138 = vmatprep.subr.bf16.mxu0 %v451_v9 }
  0x12   :  { %421 = vmatpush3.bf16.msra.mxu1 %v470_v23 }
  0x13   :  { %139 = vmatpush1.bf16.msra.mxu0 %v453_v12  ;;  %422 = vmatprep.subr.bf16.mxu1 %v471_v24 }
  0x14   :  { %140 = vmatprep.subr.bf16.mxu0 %v454_v16 }
  0x16   :  { %423 = vmatpush3.bf16.msra.mxu1 %v472_v25 }
  0x17   :  { %141 = vmatpush1.bf16.msra.mxu0 %v456_v17  ;;  %424 = vmatprep.subr.bf16.mxu1 %v473_v27 }
  0x18   :  { %142 = vmatprep.subr.bf16.mxu0 %v457_v20 }
  0x1a   :  { %425 = vmatpush3.bf16.msra.mxu1 %v474_v28 }
  0x1b   :  { %143 = vmatpush1.bf16.msra.mxu0 %v459_v21  ;;  %426 = vmatprep.subr.bf16.mxu1 %v475_v30 }
  0x1c   :  { %144 = vmatprep.subr.bf16.mxu0 %v460_v22 }
  0x1e   :  { %427 = vmatpush3.bf16.msra.mxu1 %v476_v31 }
  0x1f   :  { %145 = vmatpush1.bf16.msra.mxu0 %v462_v26  ;;  %428 = vmatprep.subr.bf16.mxu1 %v477_v32 }
  0x22   :  { %163 = vmatmul.mubr.bf16.vlgmr.msra.gmra.mrb[0].mxu0 %v21_v29  ;;  %429 = vmatpush3.bf16.msra.mxu1 %v478_v33 }
  0xf5   :  { %v164_v41 = vpop.f32.mrb[0].mxu0 }
  0xf6   :  { %v165_v42 = vadd.f32 %v164_v41, %v43_v39  ;;  %v166_v43 = vpop.f32.mrb[1].mxu0 }
  0xf7   :  { %v167_v44 = vadd.f32 %v166_v43, %v47_v40  ;;  %v168_v45 = vpop.f32.mrb[2].mxu0 }
  0xf8   :  { %v171_v46 = vmax.f32 %v165_v42, 0.0  ;;  %v169_v47 = vpop.f32.mrb[3].mxu0 }
  0xf9   :  { %v172_v48 = vmax.f32 %v167_v44, 0.0 }
  0xfa   :  { %v173_v50 = vpack.c.bf16 %v171_v46, %v171_v46 }
  0xfb   :  { %v174_v49 = vpack.c.bf16 %v172_v48, %v172_v48 }
  0xfd   :  { %342 = vmatprep.mubr.bf16.mxu1 %v174_v49 }
  0xfe   :  { %343 = vmatmul.mubr.bf16.vlgmr.msra.gmra.mrb[0].mxu1 %v173_v50 }
 0x1d1   :  { %v430_v52 = vpop.f32.mrb[0].mxu1 }
 0x1d2   :  { %v431_v54 = vpop.f32.mrb[1].mxu1 }
 0x1d3   :  { %v432_v55 = vadd.f32 %v431_v54, %v430_v52  ;;  %v433_v56 = vpop.f32.mrb[2].mxu1 }
 0x1d4   :  { %v434_v57 = vpop.f32.mrb[3].mxu1 }
 0x1d5   :  { %v345_v58 = vadd.f32 %v432_v55, %v397_v53 }
 0x1d7   :  { %v355_v59 = vsel %vm354_vm2, %v345_v58, 0.0  ;;  %v369_v61 = vsel %vm368_vm4, %v345_v58, 0.0 }
 0x1d8   :  { %v357_v60 = vsel %vm356_vm3, %v355_v59, 0.0  ;;  %v370_v62 = vsel %vm356_vm3, %v369_v61, 0.0 }
 0x1d9   :  { %358 = vadd.xlane.f32.xlu0 %v357_v60 }
 0x1dd   :  { %371 = vadd.xlane.f32.xlu0 %v370_v62 }
 0x266   :  { %v359_v63 = vpop.xlane.xlu0 %358 }
 0x267   :  { %v360_v0 = vrot.slane %v359_v63, 4 }
 0x269   :  { %v361_v1 = vadd.f32 %v360_v0, %v359_v63 }
 0x26a   :  { %v372_v6 = vpop.xlane.xlu0 %371 }
 0x26b   :  { %v362_v2 = vrot.slane %v361_v1, 2  ;;  %v373_v7 = vadd.f32 %v372_v6, %v345_v58 }
 0x26d   :  { %v363_v3 = vadd.f32 %v362_v2, %v361_v1 }
 0x26f   :  { %v364_v4 = vrot.slane %v363_v3, 1 }
 0x271   :  { %v365_v5 = vadd.f32 %v364_v4, %v363_v3 }
 0x273   :  { %436 = vpush %v365_v5 }
 0x2a4   :  { %s437_s4 = spop %436 }
 0x2a5   :  { %s367_s9 = smul.f32 0.125, %s437_s4 }
 0x2a7   :  { %v374_v8 = vstv %s367_s9 }
 0x2a8   :  { %v375_v9 = vsub.f32 %v373_v7, %v374_v8 }
 0x2aa   :  { %376 = vst [vmem:[%s623_s5] sm:$0x3] %v375_v9 }

// kernel: forward.5
= control target key start
LH: loop header
LB: loop body
LE: loop exit
PB: predicated region body
PF: predicated region fallthrough
CT: control target
= control target key end

     0   :  { %s2638_s1 = inlined_call_operand.vmem [shape: bf16[2048,128], index: 1, kind: input, shape index: {}]   ;;  %s2639_s0 = inlined_call_operand.vmem [shape: bf16[18,2048], index: 0, kind: input, shape index: {}]   ;;  %s2640_s2 = inlined_call_operand.vmem [shape: f32[1,128], index: 2, kind: input, shape index: {}]   ;;  %s2641_s3 = inlined_call_operand.vmem [shape: bf16[18,128], index: 3, kind: output, shape index: {}]  }
   0x1   :  { %v2009_v0 = vld [vmem:[%s2638_s1 + $0x40] sm:$0xff]   ;;  %v2013_v4 = vld [vmem:[%s2638_s1 + $0x48] sm:$0xff]   ;;  %v2017_v8 = vld [vmem:[%s2638_s1 + $0x50] sm:$0xff]  }
   0x2   :  { %v2010_v1 = vld [vmem:[%s2638_s1 + $0xc0] sm:$0xff]   ;;  %1785 = vmatprep.subr.bf16.mxu0 %v2009_v0  ;;  %v2014_v5 = vld [vmem:[%s2638_s1 + $0xc8] sm:$0xff]   ;;  %v2018_v9 = vld [vmem:[%s2638_s1 + $0xd0] sm:$0xff]  }
   0x3   :  { %v2011_v2 = vld [vmem:[%s2638_s1] sm:$0xff]   ;;  %1813 = vmatprep.subr.bf16.mxu1 %v2010_v1  ;;  %v2015_v6 = vld [vmem:[%s2638_s1 + $0x8] sm:$0xff]   ;;  %v2019_v10 = vld [vmem:[%s2638_s1 + $0x10] sm:$0xff]  }
   0x4   :  { %v2012_v3 = vld [vmem:[%s2638_s1 + $0x80] sm:$0xff]   ;;  %1786 = vmatpush3.bf16.msra.mxu0 %v2011_v2  ;;  %v2016_v7 = vld [vmem:[%s2638_s1 + $0x88] sm:$0xff]   ;;  %v2020_v11 = vld [vmem:[%s2638_s1 + $0x90] sm:$0xff]  }
   0x5   :  { %1814 = vmatpush3.bf16.msra.mxu1 %v2012_v3  ;;  %1787 = vmatprep.subr.bf16.mxu0 %v2013_v4  ;;  %v2021_v12 = vld [vmem:[%s2638_s1 + $0x58] sm:$0xff]   ;;  %v2025_v16 = vld [vmem:[%s2638_s1 + $0x60] sm:$0xff]   ;;  %v2029_v20 = vld [vmem:[%s2638_s1 + $0x68] sm:$0xff]  }
   0x6   :  { %1815 = vmatprep.subr.bf16.mxu1 %v2014_v5  ;;  %v2022_v13 = vld [vmem:[%s2638_s1 + $0xd8] sm:$0xff]   ;;  %v2026_v17 = vld [vmem:[%s2638_s1 + $0xe0] sm:$0xff]   ;;  %v2030_v21 = vld [vmem:[%s2638_s1 + $0xe8] sm:$0xff]  }
   0x7   :  { %v2023_v14 = vld [vmem:[%s2638_s1 + $0x18] sm:$0xff]   ;;  %v2027_v18 = vld [vmem:[%s2638_s1 + $0x20] sm:$0xff]   ;;  %v2031_v22 = vld [vmem:[%s2638_s1 + $0x28] sm:$0xff]  }
   0x8   :  { %1788 = vmatpush3.bf16.msra.mxu0 %v2015_v6  ;;  %v2024_v15 = vld [vmem:[%s2638_s1 + $0x98] sm:$0xff]   ;;  %v2028_v19 = vld [vmem:[%s2638_s1 + $0xa0] sm:$0xff]   ;;  %v2032_v23 = vld [vmem:[%s2638_s1 + $0xa8] sm:$0xff]  }
   0x9   :  { %1816 = vmatpush3.bf16.msra.mxu1 %v2016_v7  ;;  %1789 = vmatprep.subr.bf16.mxu0 %v2017_v8  ;;  %v2033_v24 = vld [vmem:[%s2638_s1 + $0x70] sm:$0xff]   ;;  %v2037_v28 = vld [vmem:[%s2638_s1 + $0x78] sm:$0xff]   ;;  %v15_v32 = vld [vmem:[%s2639_s0] sm:$0xff] }
   0xa   :  { %1817 = vmatprep.subr.bf16.mxu1 %v2018_v9  ;;  %v2034_v25 = vld [vmem:[%s2638_s1 + $0xf0] sm:$0xff]   ;;  %v2038_v29 = vld [vmem:[%s2638_s1 + $0xf8] sm:$0xff]   ;;  %v23_v33 = vld [vmem:[%s2639_s0 + $0x40] sm:$0xff] }
   0xb   :  { %v2035_v26 = vld [vmem:[%s2638_s1 + $0x30] sm:$0xff]   ;;  %v2039_v30 = vld [vmem:[%s2638_s1 + $0x38] sm:$0xff]   ;;  %v16_v34 = vld [vmem:[%s2639_s0 + $0x8] sm:$0xff]  ;;  %v1614_v35 = vcombine.low %v15_v32, %v23_v33  ;;  %v1615_v36 = vcombine.high %v15_v32, %v23_v33 }
   0xc   :  { %1790 = vmatpush3.bf16.msra.mxu0 %v2019_v10  ;;  %v2036_v27 = vld [vmem:[%s2638_s1 + $0xb0] sm:$0xff]   ;;  %v2040_v31 = vld [vmem:[%s2638_s1 + $0xb8] sm:$0xff]   ;;  %v24_v37 = vld [vmem:[%s2639_s0 + $0x48] sm:$0xff] }
   0xd   :  { %1818 = vmatpush3.bf16.msra.mxu1 %v2020_v11  ;;  %1791 = vmatprep.subr.bf16.mxu0 %v2021_v12  ;;  %v1616_v38 = vcombine.low %v16_v34, %v24_v37  ;;  %v1617_v39 = vcombine.high %v16_v34, %v24_v37  ;;  %v2041_v40 = vld [vmem:[%s2638_s1 + $0x140] sm:$0xff]   ;;  %v2045_v44 = vld [vmem:[%s2638_s1 + $0x148] sm:$0xff]   ;;  %v2049_v48 = vld [vmem:[%s2638_s1 + $0x150] sm:$0xff]  }
   0xe   :  { %1819 = vmatprep.subr.bf16.mxu1 %v2022_v13  ;;  %1238 = vmatprep.mubr.bf16.mxu0 %v1615_v36  ;;  %v2042_v41 = vld [vmem:[%s2638_s1 + $0x1c0] sm:$0xff]   ;;  %v2046_v45 = vld [vmem:[%s2638_s1 + $0x1c8] sm:$0xff]   ;;  %v2050_v49 = vld [vmem:[%s2638_s1 + $0x1d0] sm:$0xff]  }
   0xf   :  { %1286 = vmatprep.mubr.bf16.mxu1 %v1617_v39  ;;  %v2043_v42 = vld [vmem:[%s2638_s1 + $0x100] sm:$0xff]   ;;  %v2047_v46 = vld [vmem:[%s2638_s1 + $0x108] sm:$0xff]   ;;  %v2051_v50 = vld [vmem:[%s2638_s1 + $0x110] sm:$0xff]  }
  0x10   :  { %1792 = vmatpush3.bf16.msra.mxu0 %v2023_v14  ;;  %v2044_v43 = vld [vmem:[%s2638_s1 + $0x180] sm:$0xff]   ;;  %v2048_v47 = vld [vmem:[%s2638_s1 + $0x188] sm:$0xff]   ;;  %v2052_v51 = vld [vmem:[%s2638_s1 + $0x190] sm:$0xff]  }
  0x11   :  { %1820 = vmatpush3.bf16.msra.mxu1 %v2024_v15  ;;  %1793 = vmatprep.subr.bf16.mxu0 %v2025_v16  ;;  %v2053_v52 = vld [vmem:[%s2638_s1 + $0x158] sm:$0xff]   ;;  %v2057_v56 = vld [vmem:[%s2638_s1 + $0x160] sm:$0xff]   ;;  %v2061_v60 = vld [vmem:[%s2638_s1 + $0x168] sm:$0xff]  }
  0x12   :  { %1821 = vmatprep.subr.bf16.mxu1 %v2026_v17  ;;  %v2054_v53 = vld [vmem:[%s2638_s1 + $0x1d8] sm:$0xff]   ;;  %v2058_v57 = vld [vmem:[%s2638_s1 + $0x1e0] sm:$0xff]   ;;  %v2062_v61 = vld [vmem:[%s2638_s1 + $0x1e8] sm:$0xff]  }
  0x13   :  { %v2055_v54 = vld [vmem:[%s2638_s1 + $0x118] sm:$0xff]   ;;  %v2059_v58 = vld [vmem:[%s2638_s1 + $0x120] sm:$0xff]   ;;  %v2064_v0 = vld [vmem:[%s2638_s1 + $0x128] sm:$0xff]  }
  0x14   :  { %1794 = vmatpush3.bf16.msra.mxu0 %v2027_v18  ;;  %v2056_v55 = vld [vmem:[%s2638_s1 + $0x198] sm:$0xff]   ;;  %v2060_v59 = vld [vmem:[%s2638_s1 + $0x1a0] sm:$0xff]   ;;  %v2065_v2 = vld [vmem:[%s2638_s1 + $0x1a8] sm:$0xff]  }
  0x15   :  { %1822 = vmatpush3.bf16.msra.mxu1 %v2028_v19  ;;  %1795 = vmatprep.subr.bf16.mxu0 %v2029_v20  ;;  %v31_v62 = vld [vmem:[%s2639_s0 + $0x80] sm:$0x11]  ;;  %v32_v3 = vld [vmem:[%s2639_s0 + $0x88] sm:$0x11]  ;;  %v2069_v6 = vld [vmem:[%s2638_s1 + $0x170] sm:$0xff]  }
  0x16   :  { %1823 = vmatprep.subr.bf16.mxu1 %v2030_v21  ;;  %v1631_v63 = vcombine.high %v31_v62, %v31_v62  ;;  %v1630_v1 = vcombine.low %v31_v62, %v31_v62  ;;  %v1633_v4 = vcombine.high %v32_v3, %v32_v3  ;;  %v1632_v5 = vcombine.low %v32_v3, %v32_v3  ;;  %v2070_v7 = vld [vmem:[%s2638_s1 + $0x1f0] sm:$0xff]   ;;  %v2073_v10 = vld [vmem:[%s2638_s1 + $0x178] sm:$0xff]   ;;  %v20_v62 = vld [vmem:[%s2639_s0 + $0x28] sm:$0xff] }
  0x17   :  { %v2071_v8 = vld [vmem:[%s2638_s1 + $0x130] sm:$0xff]   ;;  %v2074_v11 = vld [vmem:[%s2638_s1 + $0x1f8] sm:$0xff]  }
  0x18   :  { %1796 = vmatpush3.bf16.msra.mxu0 %v2031_v22  ;;  %v2072_v9 = vld [vmem:[%s2638_s1 + $0x1b0] sm:$0xff]   ;;  %v2075_v12 = vld [vmem:[%s2638_s1 + $0x138] sm:$0xff]   ;;  %v2077_v22 = vld [vmem:[%s2638_s1 + $0x240] sm:$0xff]  }
  0x19   :  { %1824 = vmatpush3.bf16.msra.mxu1 %v2032_v23  ;;  %1797 = vmatprep.subr.bf16.mxu0 %v2033_v24  ;;  %v2076_v13 = vld [vmem:[%s2638_s1 + $0x1b8] sm:$0xff]   ;;  %v17_v14 = vld [vmem:[%s2639_s0 + $0x10] sm:$0xff]  ;;  %v2078_v23 = vld [vmem:[%s2638_s1 + $0x2c0] sm:$0xff]  }
  0x1a   :  { %1825 = vmatprep.subr.bf16.mxu1 %v2034_v25  ;;  %v25_v15 = vld [vmem:[%s2639_s0 + $0x50] sm:$0xff]  ;;  %v18_v16 = vld [vmem:[%s2639_s0 + $0x18] sm:$0xff]  ;;  %v2079_v24 = vld [vmem:[%s2638_s1 + $0x200] sm:$0xff]  }
  0x1b   :  { %v1618_v17 = vcombine.low %v17_v14, %v25_v15  ;;  %v1619_v18 = vcombine.high %v17_v14, %v25_v15  ;;  %v26_v19 = vld [vmem:[%s2639_s0 + $0x58] sm:$0xff]  ;;  %v2080_v25 = vld [vmem:[%s2638_s1 + $0x280] sm:$0xff]   ;;  %v2087_v33 = vld [vmem:[%s2638_s1 + $0x250] sm:$0xff]  }
  0x1c   :  { %1798 = vmatpush3.bf16.msra.mxu0 %v2035_v26  ;;  %v1620_v20 = vcombine.low %v18_v16, %v26_v19  ;;  %v1621_v21 = vcombine.high %v18_v16, %v26_v19  ;;  %v2081_v26 = vld [vmem:[%s2638_s1 + $0x248] sm:$0xff]   ;;  %v2088_v34 = vld [vmem:[%s2638_s1 + $0x2d0] sm:$0xff]  }
  0x1d   :  { %1826 = vmatpush3.bf16.msra.mxu1 %v2036_v27  ;;  %1799 = vmatprep.subr.bf16.mxu0 %v2037_v28  ;;  %v2082_v27 = vld [vmem:[%s2638_s1 + $0x2c8] sm:$0xff]   ;;  %v2090_v37 = vld [vmem:[%s2638_s1 + $0x210] sm:$0xff]  }
  0x1e   :  { %1827 = vmatprep.subr.bf16.mxu1 %v2038_v29  ;;  %v2083_v28 = vld [vmem:[%s2638_s1 + $0x208] sm:$0xff]   ;;  %v2091_v39 = vld [vmem:[%s2638_s1 + $0x290] sm:$0xff]  }
  0x1f   :  { %v2084_v29 = vld [vmem:[%s2638_s1 + $0x288] sm:$0xff]   ;;  %v2123_v15 = vld [vmem:[%s2638_s1 + $0x350] sm:$0xff]  }
  0x20   :  { %1800 = vmatpush3.bf16.msra.mxu0 %v2039_v30  ;;  %v33_v30 = vld [vmem:[%s2639_s0 + $0x90] sm:$0x11] }
  0x21   :  { %1828 = vmatpush3.bf16.msra.mxu1 %v2040_v31  ;;  %1841 = vmatprep.subr.bf16.mxu0 %v2041_v40  ;;  %v1635_v31 = vcombine.high %v33_v30, %v33_v30  ;;  %v1634_v32 = vcombine.low %v33_v30, %v33_v30  ;;  %v2093_v40 = vld [vmem:[%s2638_s1 + $0x258] sm:$0xff]   ;;  %v2124_v16 = vld [vmem:[%s2638_s1 + $0x3d0] sm:$0xff]   ;;  %v2137_v30 = vld [vmem:[%s2638_s1 + $0x368] sm:$0xff]  }
  0x22   :  { %1869 = vmatprep.subr.bf16.mxu1 %v2042_v41  ;;  %v2094_v41 = vld [vmem:[%s2638_s1 + $0x2d8] sm:$0xff]   ;;  %v2126_v19 = vld [vmem:[%s2638_s1 + $0x310] sm:$0xff]  }
  0x23   :  { %1239 = vmatmul.mubr.bf16.vlgmr.msra.gmra.mrb[0].mxu0 %v1614_v35  ;;  %v34_v35 = vld [vmem:[%s2639_s0 + $0x98] sm:$0x11] }
  0x24   :  { %1287 = vmatmul.mubr.bf16.vlgmr.msra.gmra.mrb[0].mxu1 %v1616_v38  ;;  %1842 = vmatpush3.bf16.msra.mxu0 %v2043_v42  ;;  %v1637_v36 = vcombine.high %v34_v35, %v34_v35  ;;  %v1636_v38 = vcombine.low %v34_v35, %v34_v35  ;;  %v2095_v42 = vld [vmem:[%s2638_s1 + $0x218] sm:$0xff]   ;;  %v2142_v35 = vld [vmem:[%s2638_s1 + $0x3f0] sm:$0xff]  }
  0x25   :  { %1870 = vmatpush3.bf16.msra.mxu1 %v2044_v43  ;;  %1843 = vmatprep.subr.bf16.mxu0 %v2045_v44  ;;  %v2096_v43 = vld [vmem:[%s2638_s1 + $0x298] sm:$0xff]   ;;  %v2097_v44 = vld [vmem:[%s2638_s1 + $0x260] sm:$0xff]  }
  0x26   :  { %1871 = vmatprep.subr.bf16.mxu1 %v2046_v45  ;;  %1246 = vmatprep.mubr.bf16.mxu0 %v1631_v63  ;;  %v2098_v45 = vld [vmem:[%s2638_s1 + $0x2e0] sm:$0xff]  }
  0x27   :  { %1294 = vmatprep.mubr.bf16.mxu1 %v1633_v4  ;;  %v2113_v4 = vld [vmem:[%s2638_s1 + $0x340] sm:$0xff]  }
  0x28   :  { %1844 = vmatpush3.bf16.msra.mxu0 %v2047_v46  ;;  %v2099_v46 = vld [vmem:[%s2638_s1 + $0x220] sm:$0xff]  }
  0x29   :  { %1872 = vmatpush3.bf16.msra.mxu1 %v2048_v47  ;;  %1845 = vmatprep.subr.bf16.mxu0 %v2049_v48  ;;  %v2100_v47 = vld [vmem:[%s2638_s1 + $0x2a0] sm:$0xff]   ;;  %v2101_v48 = vld [vmem:[%s2638_s1 + $0x268] sm:$0xff]  }
  0x2a   :  { %1873 = vmatprep.subr.bf16.mxu1 %v2050_v49  ;;  %v2102_v49 = vld [vmem:[%s2638_s1 + $0x2e8] sm:$0xff]  }
  0x2b   :  { %1247 = vmatmul.mubr.bf16.gmra.mrb[4].mxu0 %v1630_v1  ;;  %v28_v1 = vld [vmem:[%s2639_s0 + $0x68] sm:$0xff] }
  0x2c   :  { %1846 = vmatpush3.bf16.msra.mxu0 %v2051_v50  ;;  %1295 = vmatmul.mubr.bf16.gmra.mrb[4].mxu1 %v1632_v5  ;;  %v2103_v50 = vld [vmem:[%s2638_s1 + $0x228] sm:$0xff]   ;;  %v1625_v3 = vcombine.high %v20_v62, %v28_v1  ;;  %v2114_v5 = vld [vmem:[%s2638_s1 + $0x3c0] sm:$0xff]  }
  0x2d   :  { %1874 = vmatpush3.bf16.msra.mxu1 %v2052_v51  ;;  %1847 = vmatprep.subr.bf16.mxu0 %v2053_v52  ;;  %v2104_v51 = vld [vmem:[%s2638_s1 + $0x2a8] sm:$0xff]   ;;  %v2105_v52 = vld [vmem:[%s2638_s1 + $0x270] sm:$0xff]  }
  0x2e   :  { %1875 = vmatprep.subr.bf16.mxu1 %v2054_v53  ;;  %1334 = vmatprep.mubr.bf16.mxu0 %v1619_v18  ;;  %v2106_v53 = vld [vmem:[%s2638_s1 + $0x2f0] sm:$0xff]  }
  0x2f   :  { %1382 = vmatprep.mubr.bf16.mxu1 %v1621_v21  ;;  %v2127_v21 = vld [vmem:[%s2638_s1 + $0x390] sm:$0xff]  }
  0x30   :  { %1848 = vmatpush3.bf16.msra.mxu0 %v2055_v54  ;;  %v2107_v54 = vld [vmem:[%s2638_s1 + $0x230] sm:$0xff]  }
  0x31   :  { %1876 = vmatpush3.bf16.msra.mxu1 %v2056_v55  ;;  %1849 = vmatprep.subr.bf16.mxu0 %v2057_v56  ;;  %v2108_v55 = vld [vmem:[%s2638_s1 + $0x2b0] sm:$0xff]   ;;  %v2109_v56 = vld [vmem:[%s2638_s1 + $0x278] sm:$0xff]  }
  0x32   :  { %1877 = vmatprep.subr.bf16.mxu1 %v2058_v57  ;;  %v2110_v57 = vld [vmem:[%s2638_s1 + $0x2f8] sm:$0xff]  }
  0x34   :  { %1850 = vmatpush3.bf16.msra.mxu0 %v2059_v58  ;;  %v2111_v58 = vld [vmem:[%s2638_s1 + $0x238] sm:$0xff]  }
  0x35   :  { %1878 = vmatpush3.bf16.msra.mxu1 %v2060_v59  ;;  %1851 = vmatprep.subr.bf16.mxu0 %v2061_v60  ;;  %v2112_v59 = vld [vmem:[%s2638_s1 + $0x2b8] sm:$0xff]   ;;  %v19_v60 = vld [vmem:[%s2639_s0 + $0x20] sm:$0xff] }
  0x36   :  { %1879 = vmatprep.subr.bf16.mxu1 %v2062_v61  ;;  %v27_v61 = vld [vmem:[%s2639_s0 + $0x60] sm:$0xff] }
  0x37   :  { %v1622_v63 = vcombine.low %v19_v60, %v27_v61 }
  0x38   :  { %1852 = vmatpush3.bf16.msra.mxu0 %v2064_v0  ;;  %v1623_v0 = vcombine.high %v19_v60, %v27_v61 }
  0x39   :  { %1880 = vmatpush3.bf16.msra.mxu1 %v2065_v2  ;;  %1853 = vmatprep.subr.bf16.mxu0 %v2069_v6  ;;  %v1624_v2 = vcombine.low %v20_v62, %v28_v1  ;;  %v2115_v6 = vld [vmem:[%s2638_s1 + $0x300] sm:$0xff]  }
  0x3a   :  { %1881 = vmatprep.subr.bf16.mxu1 %v2070_v7  ;;  %v2116_v7 = vld [vmem:[%s2638_s1 + $0x380] sm:$0xff]  }
  0x3c   :  { %1854 = vmatpush3.bf16.msra.mxu0 %v2071_v8  ;;  %v2117_v8 = vld [vmem:[%s2638_s1 + $0x348] sm:$0xff]  }
  0x3d   :  { %1882 = vmatpush3.bf16.msra.mxu1 %v2072_v9  ;;  %1855 = vmatprep.subr.bf16.mxu0 %v2073_v10  ;;  %v2118_v9 = vld [vmem:[%s2638_s1 + $0x3c8] sm:$0xff]  }
  0x3e   :  { %1883 = vmatprep.subr.bf16.mxu1 %v2074_v11  ;;  %v2119_v10 = vld [vmem:[%s2638_s1 + $0x308] sm:$0xff]  }
  0x3f   :  { %v2120_v11 = vld [vmem:[%s2638_s1 + $0x388] sm:$0xff]  }
  0x40   :  { %1856 = vmatpush3.bf16.msra.mxu0 %v2075_v12  ;;  %v35_v12 = vld [vmem:[%s2639_s0 + $0xa0] sm:$0x11] }
  0x41   :  { %1884 = vmatpush3.bf16.msra.mxu1 %v2076_v13  ;;  %1897 = vmatprep.subr.bf16.mxu0 %v2077_v22  ;;  %v1639_v13 = vcombine.high %v35_v12, %v35_v12  ;;  %v1638_v14 = vcombine.low %v35_v12, %v35_v12  ;;  %v2129_v22 = vld [vmem:[%s2638_s1 + $0x358] sm:$0xff]  }
  0x42   :  { %1925 = vmatprep.subr.bf16.mxu1 %v2078_v23  ;;  %v2130_v23 = vld [vmem:[%s2638_s1 + $0x3d8] sm:$0xff]  }
  0x43   :  { %1335 = vmatmul.mubr.bf16.vlgmr.msra.gmra.mrb[8].mxu0 %v1618_v17  ;;  %v36_v17 = vld [vmem:[%s2639_s0 + $0xa8] sm:$0x11] }
  0x44   :  { %1383 = vmatmul.mubr.bf16.vlgmr.msra.gmra.mrb[8].mxu1 %v1620_v20  ;;  %1898 = vmatpush3.bf16.msra.mxu0 %v2079_v24  ;;  %v1641_v18 = vcombine.high %v36_v17, %v36_v17  ;;  %v1640_v20 = vcombine.low %v36_v17, %v36_v17  ;;  %v2131_v24 = vld [vmem:[%s2638_s1 + $0x318] sm:$0xff]  }
  0x45   :  { %1926 = vmatpush3.bf16.msra.mxu1 %v2080_v25  ;;  %1899 = vmatprep.subr.bf16.mxu0 %v2081_v26  ;;  %v2132_v25 = vld [vmem:[%s2638_s1 + $0x398] sm:$0xff]   ;;  %v2133_v26 = vld [vmem:[%s2638_s1 + $0x360] sm:$0xff]  }
  0x46   :  { %1927 = vmatprep.subr.bf16.mxu1 %v2082_v27  ;;  %1342 = vmatprep.mubr.bf16.mxu0 %v1635_v31  ;;  %v2134_v27 = vld [vmem:[%s2638_s1 + $0x3e0] sm:$0xff]   ;;  %v2138_v31 = vld [vmem:[%s2638_s1 + $0x3e8] sm:$0xff]  }
  0x47   :  { %1390 = vmatprep.mubr.bf16.mxu1 %v1637_v36  ;;  %v2143_v36 = vld [vmem:[%s2638_s1 + $0x330] sm:$0xff]  }
  0x48   :  { %1900 = vmatpush3.bf16.msra.mxu0 %v2083_v28  ;;  %v2135_v28 = vld [vmem:[%s2638_s1 + $0x320] sm:$0xff]  }
  0x49   :  { %1928 = vmatpush3.bf16.msra.mxu1 %v2084_v29  ;;  %1901 = vmatprep.subr.bf16.mxu0 %v2087_v33  ;;  %v2136_v29 = vld [vmem:[%s2638_s1 + $0x3a0] sm:$0xff]   ;;  %v2140_v33 = vld [vmem:[%s2638_s1 + $0x3a8] sm:$0xff]  }
  0x4a   :  { %1929 = vmatprep.subr.bf16.mxu1 %v2088_v34  ;;  %v2141_v34 = vld [vmem:[%s2638_s1 + $0x370] sm:$0xff]  }
  0x4b   :  { %1343 = vmatmul.mubr.bf16.gmra.mrb[12].mxu0 %v1634_v32  ;;  %v2139_v32 = vld [vmem:[%s2638_s1 + $0x328] sm:$0xff]  }
  0x4c   :  { %1902 = vmatpush3.bf16.msra.mxu0 %v2090_v37  ;;  %1391 = vmatmul.mubr.bf16.gmra.mrb[12].mxu1 %v1636_v38  ;;  %v2144_v37 = vld [vmem:[%s2638_s1 + $0x3b0] sm:$0xff]   ;;  %v2145_v38 = vld [vmem:[%s2638_s1 + $0x378] sm:$0xff]  }
  0x4d   :  { %1930 = vmatpush3.bf16.msra.mxu1 %v2091_v39  ;;  %1903 = vmatprep.subr.bf16.mxu0 %v2093_v40  ;;  %v2146_v39 = vld [vmem:[%s2638_s1 + $0x3f8] sm:$0xff]  }
  0x4e   :  { %1931 = vmatprep.subr.bf16.mxu1 %v2094_v41  ;;  %1430 = vmatprep.mubr.bf16.mxu0 %v1623_v0  ;;  %v2147_v40 = vld [vmem:[%s2638_s1 + $0x338] sm:$0xff]  }
  0x4f   :  { %1478 = vmatprep.mubr.bf16.mxu1 %v1625_v3  ;;  %v2148_v41 = vld [vmem:[%s2638_s1 + $0x3b8] sm:$0xff]  }
  0x50   :  { %1904 = vmatpush3.bf16.msra.mxu0 %v2095_v42  ;;  %v21_v42 = vld [vmem:[%s2639_s0 + $0x30] sm:$0xff] }
  0x51   :  { %1932 = vmatpush3.bf16.msra.mxu1 %v2096_v43  ;;  %1905 = vmatprep.subr.bf16.mxu0 %v2097_v44  ;;  %v29_v43 = vld [vmem:[%s2639_s0 + $0x70] sm:$0xff]  ;;  %v22_v44 = vld [vmem:[%s2639_s0 + $0x38] sm:$0xff] }
  0x52   :  { %1933 = vmatprep.subr.bf16.mxu1 %v2098_v45  ;;  %v1626_v45 = vcombine.low %v21_v42, %v29_v43 }
  0x54   :  { %1906 = vmatpush3.bf16.msra.mxu0 %v2099_v46  ;;  %v1627_v46 = vcombine.high %v21_v42, %v29_v43 }
  0x55   :  { %1934 = vmatpush3.bf16.msra.mxu1 %v2100_v47  ;;  %1907 = vmatprep.subr.bf16.mxu0 %v2101_v48  ;;  %v30_v47 = vld [vmem:[%s2639_s0 + $0x78] sm:$0xff]  ;;  %v37_v48 = vld [vmem:[%s2639_s0 + $0xb0] sm:$0x11] }
  0x56   :  { %1935 = vmatprep.subr.bf16.mxu1 %v2102_v49  ;;  %v38_v49 = vld [vmem:[%s2639_s0 + $0xb8] sm:$0x11] }
  0x58   :  { %1908 = vmatpush3.bf16.msra.mxu0 %v2103_v50  ;;  %v1628_v50 = vcombine.low %v22_v44, %v30_v47 }
  0x59   :  { %1936 = vmatpush3.bf16.msra.mxu1 %v2104_v51  ;;  %1909 = vmatprep.subr.bf16.mxu0 %v2105_v52  ;;  %v1629_v51 = vcombine.high %v22_v44, %v30_v47  ;;  %v1643_v52 = vcombine.high %v37_v48, %v37_v48 }
  0x5a   :  { %1937 = vmatprep.subr.bf16.mxu1 %v2106_v53  ;;  %v1645_v53 = vcombine.high %v38_v49, %v38_v49 }
  0x5c   :  { %1910 = vmatpush3.bf16.msra.mxu0 %v2107_v54  ;;  %v1642_v54 = vcombine.low %v37_v48, %v37_v48 }
  0x5d   :  { %1938 = vmatpush3.bf16.msra.mxu1 %v2108_v55  ;;  %1911 = vmatprep.subr.bf16.mxu0 %v2109_v56  ;;  %v1644_v55 = vcombine.low %v38_v49, %v38_v49 }
  0x5e   :  { %1939 = vmatprep.subr.bf16.mxu1 %v2110_v57 }
  0x60   :  { %1912 = vmatpush3.bf16.msra.mxu0 %v2111_v58  ;;  %v1613_v58 = vld [vmem:[%s2640_s2] ss:$0 sm:$0xff] }
  0x61   :  { %1940 = vmatpush3.bf16.msra.mxu1 %v2112_v59  ;;  %1953 = vmatprep.subr.bf16.mxu0 %v2113_v4 }
  0x62   :  { %1981 = vmatprep.subr.bf16.mxu1 %v2114_v5 }
  0x63   :  { %1431 = vmatmul.mubr.bf16.vlgmr.msra.gmra.mrb[16].mxu0 %v1622_v63 }
  0x64   :  { %1479 = vmatmul.mubr.bf16.vlgmr.msra.gmra.mrb[16].mxu1 %v1624_v2  ;;  %1954 = vmatpush3.bf16.msra.mxu0 %v2115_v6 }
  0x65   :  { %1982 = vmatpush3.bf16.msra.mxu1 %v2116_v7  ;;  %1955 = vmatprep.subr.bf16.mxu0 %v2117_v8 }
  0x66   :  { %1983 = vmatprep.subr.bf16.mxu1 %v2118_v9  ;;  %1438 = vmatprep.mubr.bf16.mxu0 %v1639_v13 }
  0x67   :  { %1486 = vmatprep.mubr.bf16.mxu1 %v1641_v18 }
  0x68   :  { %1956 = vmatpush3.bf16.msra.mxu0 %v2119_v10 }
  0x69   :  { %1984 = vmatpush3.bf16.msra.mxu1 %v2120_v11  ;;  %1957 = vmatprep.subr.bf16.mxu0 %v2123_v15 }
  0x6a   :  { %1985 = vmatprep.subr.bf16.mxu1 %v2124_v16 }
  0x6b   :  { %1439 = vmatmul.mubr.bf16.gmra.mrb[20].mxu0 %v1638_v14 }
  0x6c   :  { %1958 = vmatpush3.bf16.msra.mxu0 %v2126_v19  ;;  %1487 = vmatmul.mubr.bf16.gmra.mrb[20].mxu1 %v1640_v20 }
  0x6d   :  { %1986 = vmatpush3.bf16.msra.mxu1 %v2127_v21  ;;  %1959 = vmatprep.subr.bf16.mxu0 %v2129_v22 }
  0x6e   :  { %1987 = vmatprep.subr.bf16.mxu1 %v2130_v23  ;;  %1526 = vmatprep.mubr.bf16.mxu0 %v1627_v46 }
  0x6f   :  { %1574 = vmatprep.mubr.bf16.mxu1 %v1629_v51 }
  0x70   :  { %1960 = vmatpush3.bf16.msra.mxu0 %v2131_v24 }
  0x71   :  { %1988 = vmatpush3.bf16.msra.mxu1 %v2132_v25  ;;  %1961 = vmatprep.subr.bf16.mxu0 %v2133_v26 }
  0x72   :  { %1989 = vmatprep.subr.bf16.mxu1 %v2134_v27 }
  0x74   :  { %1962 = vmatpush3.bf16.msra.mxu0 %v2135_v28 }
  0x75   :  { %1990 = vmatpush3.bf16.msra.mxu1 %v2136_v29  ;;  %1963 = vmatprep.subr.bf16.mxu0 %v2137_v30 }
  0x76   :  { %1991 = vmatprep.subr.bf16.mxu1 %v2138_v31 }
  0x78   :  { %1964 = vmatpush3.bf16.msra.mxu0 %v2139_v32 }
  0x79   :  { %1992 = vmatpush3.bf16.msra.mxu1 %v2140_v33  ;;  %1965 = vmatprep.subr.bf16.mxu0 %v2141_v34 }
  0x7a   :  { %1993 = vmatprep.subr.bf16.mxu1 %v2142_v35 }
  0x7c   :  { %1966 = vmatpush3.bf16.msra.mxu0 %v2143_v36 }
  0x7d   :  { %1994 = vmatpush3.bf16.msra.mxu1 %v2144_v37  ;;  %1967 = vmatprep.subr.bf16.mxu0 %v2145_v38 }
  0x7e   :  { %1995 = vmatprep.subr.bf16.mxu1 %v2146_v39 }
  0x80   :  { %1968 = vmatpush3.bf16.msra.mxu0 %v2147_v40 }
  0x81   :  { %1996 = vmatpush3.bf16.msra.mxu1 %v2148_v41 }
  0x83   :  { %1527 = vmatmul.mubr.bf16.vlgmr.msra.gmra.mrb[24].mxu0 %v1626_v45 }
  0x84   :  { %1575 = vmatmul.mubr.bf16.vlgmr.msra.gmra.mrb[24].mxu1 %v1628_v50  ;;  %1534 = vmatprep.mubr.bf16.mxu0 %v1643_v52 }
  0x85   :  { %1582 = vmatprep.mubr.bf16.mxu1 %v1645_v53 }
  0x8b   :  { %1535 = vmatmul.mubr.bf16.gmra.mrb[28].mxu0 %v1642_v54 }
  0x8c   :  { %1583 = vmatmul.mubr.bf16.gmra.mrb[28].mxu1 %v1644_v55 }
  0xf6   :  { %v1801_v56 = vpop.f32.mrb[0].mxu0 }
  0xf7   :  { %v1829_v57 = vpop.f32.mrb[0].mxu1  ;;  %v1802_v59 = vpop.f32.mrb[1].mxu0 }
  0xf8   :  { %v1803_v60 = vadd.f32 %v1802_v59, %v1801_v56  ;;  %v1830_v61 = vpop.f32.mrb[1].mxu1  ;;  %v1804_v62 = vpop.f32.mrb[2].mxu0 }
  0xf9   :  { %v1831_v63 = vadd.f32 %v1830_v61, %v1829_v57  ;;  %v1832_v0 = vpop.f32.mrb[2].mxu1  ;;  %v1805_v1 = vpop.f32.mrb[3].mxu0 }
  0xfa   :  { %v1241_v2 = vadd.f32 %v1803_v60, %v1613_v58  ;;  %v1806_v3 = vadd.f32 %v1805_v1, %v1804_v62  ;;  %v1833_v4 = vpop.f32.mrb[3].mxu1 }
  0xfb   :  { %v1834_v5 = vadd.f32 %v1833_v4, %v1832_v0 }
  0xfc   :  { %v1289_v6 = vadd.f32 %v1831_v63, %v1241_v2  ;;  %v1244_v7 = vadd.f32 %v1806_v3, %v1613_v58 }
  0xfe   :  { %v1292_v8 = vadd.f32 %v1834_v5, %v1244_v7  ;;  %v1807_v9 = vpop.f32.mrb[4].mxu0 }
  0xff   :  { %v1808_v10 = vpop.f32.mrb[5].mxu0  ;;  %v1835_v13 = vpop.f32.mrb[4].mxu1 }
 0x100   :  { %v1809_v11 = vadd.f32 %v1808_v10, %v1807_v9  ;;  %v1810_v12 = vpop.f32.mrb[6].mxu0  ;;  %v1836_v15 = vpop.f32.mrb[5].mxu1 }
 0x101   :  { %v1811_v14 = vpop.f32.mrb[7].mxu0  ;;  %v1837_v17 = vadd.f32 %v1836_v15, %v1835_v13  ;;  %v1838_v18 = vpop.f32.mrb[6].mxu1 }
 0x102   :  { %v1249_v16 = vadd.f32 %v1809_v11, %v1613_v58  ;;  %v1839_v19 = vpop.f32.mrb[7].mxu1 }
 0x104   :  { %v1297_v20 = vadd.f32 %v1837_v17, %v1249_v16 }
 0x116   :  { %v1857_v21 = vpop.f32.mrb[8].mxu0 }
 0x117   :  { %v1885_v22 = vpop.f32.mrb[8].mxu1  ;;  %v1858_v23 = vpop.f32.mrb[9].mxu0 }
 0x118   :  { %v1859_v24 = vadd.f32 %v1858_v23, %v1857_v21  ;;  %v1886_v25 = vpop.f32.mrb[9].mxu1  ;;  %v1860_v26 = vpop.f32.mrb[10].mxu0 }
 0x119   :  { %v1887_v27 = vadd.f32 %v1886_v25, %v1885_v22  ;;  %v1888_v28 = vpop.f32.mrb[10].mxu1  ;;  %v1861_v29 = vpop.f32.mrb[11].mxu0 }
 0x11a   :  { %v1337_v30 = vadd.f32 %v1859_v24, %v1289_v6  ;;  %v1862_v31 = vadd.f32 %v1861_v29, %v1860_v26  ;;  %v1889_v32 = vpop.f32.mrb[11].mxu1 }
 0x11b   :  { %v1890_v33 = vadd.f32 %v1889_v32, %v1888_v28 }
 0x11c   :  { %v1385_v34 = vadd.f32 %v1887_v27, %v1337_v30  ;;  %v1340_v35 = vadd.f32 %v1862_v31, %v1292_v8 }
 0x11e   :  { %v1388_v36 = vadd.f32 %v1890_v33, %v1340_v35  ;;  %v1863_v37 = vpop.f32.mrb[12].mxu0 }
 0x11f   :  { %v1864_v38 = vpop.f32.mrb[13].mxu0  ;;  %v1891_v41 = vpop.f32.mrb[12].mxu1 }
 0x120   :  { %v1865_v39 = vadd.f32 %v1864_v38, %v1863_v37  ;;  %v1866_v40 = vpop.f32.mrb[14].mxu0  ;;  %v1892_v44 = vpop.f32.mrb[13].mxu1 }
 0x121   :  { %v1867_v42 = vpop.f32.mrb[15].mxu0  ;;  %v1893_v45 = vadd.f32 %v1892_v44, %v1891_v41  ;;  %v1894_v46 = vpop.f32.mrb[14].mxu1 }
 0x122   :  { %v1345_v43 = vadd.f32 %v1865_v39, %v1297_v20  ;;  %v1895_v47 = vpop.f32.mrb[15].mxu1 }
 0x124   :  { %v1393_v48 = vadd.f32 %v1893_v45, %v1345_v43 }
 0x136   :  { %v1913_v49 = vpop.f32.mrb[16].mxu0 }
 0x137   :  { %v1941_v50 = vpop.f32.mrb[16].mxu1  ;;  %v1914_v51 = vpop.f32.mrb[17].mxu0 }
 0x138   :  { %v1915_v52 = vadd.f32 %v1914_v51, %v1913_v49  ;;  %v1942_v53 = vpop.f32.mrb[17].mxu1  ;;  %v1916_v54 = vpop.f32.mrb[18].mxu0 }
 0x139   :  { %v1943_v55 = vadd.f32 %v1942_v53, %v1941_v50  ;;  %v1944_v56 = vpop.f32.mrb[18].mxu1  ;;  %v1917_v57 = vpop.f32.mrb[19].mxu0 }
 0x13a   :  { %v1433_v58 = vadd.f32 %v1915_v52, %v1385_v34  ;;  %v1918_v59 = vadd.f32 %v1917_v57, %v1916_v54  ;;  %v1945_v60 = vpop.f32.mrb[19].mxu1 }
 0x13b   :  { %v1946_v61 = vadd.f32 %v1945_v60, %v1944_v56 }
 0x13c   :  { %v1481_v62 = vadd.f32 %v1943_v55, %v1433_v58  ;;  %v1436_v63 = vadd.f32 %v1918_v59, %v1388_v36 }
 0x13e   :  { %v1484_v0 = vadd.f32 %v1946_v61, %v1436_v63  ;;  %v1919_v1 = vpop.f32.mrb[20].mxu0 }
 0x13f   :  { %v1920_v2 = vpop.f32.mrb[21].mxu0  ;;  %v1947_v5 = vpop.f32.mrb[20].mxu1 }
 0x140   :  { %v1921_v3 = vadd.f32 %v1920_v2, %v1919_v1  ;;  %v1922_v4 = vpop.f32.mrb[22].mxu0  ;;  %v1948_v8 = vpop.f32.mrb[21].mxu1 }
 0x141   :  { %v1923_v6 = vpop.f32.mrb[23].mxu0  ;;  %v1949_v9 = vadd.f32 %v1948_v8, %v1947_v5  ;;  %v1950_v10 = vpop.f32.mrb[22].mxu1 }
 0x142   :  { %v1441_v7 = vadd.f32 %v1921_v3, %v1393_v48  ;;  %v1951_v11 = vpop.f32.mrb[23].mxu1 }
 0x144   :  { %v1489_v12 = vadd.f32 %v1949_v9, %v1441_v7 }
 0x156   :  { %v1969_v13 = vpop.f32.mrb[24].mxu0 }
 0x157   :  { %v1997_v14 = vpop.f32.mrb[24].mxu1  ;;  %v1970_v15 = vpop.f32.mrb[25].mxu0 }
 0x158   :  { %v1971_v16 = vadd.f32 %v1970_v15, %v1969_v13  ;;  %v1998_v17 = vpop.f32.mrb[25].mxu1  ;;  %v1972_v18 = vpop.f32.mrb[26].mxu0 }
 0x159   :  { %v1999_v19 = vadd.f32 %v1998_v17, %v1997_v14  ;;  %v2000_v20 = vpop.f32.mrb[26].mxu1  ;;  %v1973_v21 = vpop.f32.mrb[27].mxu0 }
 0x15a   :  { %v1529_v22 = vadd.f32 %v1971_v16, %v1481_v62  ;;  %v1974_v23 = vadd.f32 %v1973_v21, %v1972_v18  ;;  %v2001_v24 = vpop.f32.mrb[27].mxu1 }
 0x15b   :  { %v2002_v25 = vadd.f32 %v2001_v24, %v2000_v20 }
 0x15c   :  { %v1577_v26 = vadd.f32 %v1999_v19, %v1529_v22  ;;  %v1532_v27 = vadd.f32 %v1974_v23, %v1484_v0 }
 0x15e   :  { %v1580_v28 = vadd.f32 %v2002_v25, %v1532_v27  ;;  %v1975_v29 = vpop.f32.mrb[28].mxu0  ;;  %v1590_v32 = vmax.f32 %v1577_v26, 0.0 }
 0x15f   :  { %v2003_v30 = vpop.f32.mrb[28].mxu1  ;;  %v1976_v31 = vpop.f32.mrb[29].mxu0 }
 0x160   :  { %v1591_v33 = vmax.f32 %v1580_v28, 0.0  ;;  %v1977_v34 = vadd.f32 %v1976_v31, %v1975_v29  ;;  %v2004_v35 = vpop.f32.mrb[29].mxu1  ;;  %v1978_v36 = vpop.f32.mrb[30].mxu0 }
 0x161   :  { %v2005_v37 = vadd.f32 %v2004_v35, %v2003_v30  ;;  %v2006_v38 = vpop.f32.mrb[30].mxu1  ;;  %v1979_v39 = vpop.f32.mrb[31].mxu0 }
 0x162   :  { %v1783_v40 = vpack.c.bf16 %v1591_v33, %v1590_v32  ;;  %v1537_v41 = vadd.f32 %v1977_v34, %v1489_v12  ;;  %v2007_v42 = vpop.f32.mrb[31].mxu1 }
 0x164   :  { %v1585_v43 = vadd.f32 %v2005_v37, %v1537_v41  ;;  %1784 = vst [vmem:[%s2641_s3] sm:$0xff] %v1783_v40  }
 0x166   :  { %v1592_v44 = vmax.f32 %v1585_v43, 0.0 }
 0x168   :  { %v1779_v45 = vpack.c.bf16 %v1592_v44, %v1592_v44 }
 0x16a   :  { %1608 = vst [vmem:[%s2641_s3 + $0x8] sm:$0x1] %v1779_v45 }

</bundles_post_ra>
